<compile_context>
chip_gen: v6e
topology: v6e:2x2x1
jax: 0.10.0
libtpu: 0.0.40
codegen_flags: <defaults>
</compile_context>

<pallas_src>
import jax
import jax.numpy as jnp
from jax.experimental import pallas as pl
from jax.experimental.pallas import tpu as pltpu

D_HIDDEN = 128  # module default


def concat_model_kernel(img_ref, text_ref, cel_ref, cap_ref,
                        w_img_ref, b_img_ref,
                        w_text_ref, b_text_ref,
                        w_cel_ref, b_cel_ref,
                        w_cap_ref, b_cap_ref,
                        w1_ref, b1_ref,
                        w2_ref, b2_ref,
                        w3_ref, b3_ref,
                        out_ref,
                        cat_ref):
    d = D_HIDDEN
    cdt = w1_ref.dtype  # bf16 compute dtype for MXU operands
    relu = lambda v: jnp.maximum(v, 0.0)
    dot = lambda a, b: jnp.dot(a, b, preferred_element_type=jnp.float32)

    # Branch FCs. Input tiles arrive f32 straight from HBM; cast to bf16 right
    # before the MXU (accumulation stays f32). Each branch's relu'd result is
    # written to its 128-lane slice of the concat scratch — this *is* torch.cat,
    # expressed as layout (order matches the module: img, text, celebrity, caption).
    h_img = relu(dot(img_ref[...].astype(cdt), w_img_ref[...]) + b_img_ref[...])
    h_text = relu(dot(text_ref[...].astype(cdt), w_text_ref[...]) + b_text_ref[...])
    h_cel = relu(dot(cel_ref[...].astype(cdt), w_cel_ref[...]) + b_cel_ref[...])
    h_cap = relu(dot(cap_ref[...].astype(cdt), w_cap_ref[...]) + b_cap_ref[...])
    cat_ref[:, 0 * d:1 * d] = h_img.astype(cat_ref.dtype)
    cat_ref[:, 1 * d:2 * d] = h_text.astype(cat_ref.dtype)
    cat_ref[:, 2 * d:3 * d] = h_cel.astype(cat_ref.dtype)
    cat_ref[:, 3 * d:4 * d] = h_cap.astype(cat_ref.dtype)

    # Classifier MLP: the concat+W1 matmul is one (TM,512)@(512,256) dot
    # (2 full-depth MXU passes on v6e/v7x, cheaper than 4 K=128 blocks).
    h1 = relu(dot(cat_ref[...], w1_ref[...]) + b1_ref[...])
    h2 = relu(dot(h1.astype(cdt), w2_ref[...]) + b2_ref[...])

    # Final 128 -> 1 layer as a VPU multiply + lane reduction (avoids a
    # 1-of-256-columns MXU matmul). w3_ref is the transposed (1,128) f32 row;
    # b3 is a scalar read from SMEM.
    y = jnp.sum(h2 * w3_ref[...], axis=-1, keepdims=True) + b3_ref[0, 0]
    out_ref[...] = y.astype(out_ref.dtype)


def make_params(key, d_hidden=D_HIDDEN, dtype=jnp.float32):
    """Deterministic synthetic weights. Linear stored as (in, out); biases as (1, out)."""
    dims = {"img": 512, "text": 768, "cel": 512, "cap": 256}
    params = {}
    keys = jax.random.split(key, 16)
    ki = iter(range(16))

    def linear(k_w, k_b, fan_in, fan_out):
        bound = 1.0 / jnp.sqrt(fan_in)
        w = jax.random.uniform(k_w, (fan_in, fan_out), dtype, -bound, bound)
        b = jax.random.uniform(k_b, (1, fan_out), dtype, -bound, bound)
        return w, b

    for name, fan_in in dims.items():
        w, b = linear(keys[next(ki)], keys[next(ki)], fan_in, d_hidden)
        params[f"w_{name}"], params[f"b_{name}"] = w, b

    params["w1"], params["b1"] = linear(keys[next(ki)], keys[next(ki)], 4 * d_hidden, 2 * d_hidden)
    params["w2"], params["b2"] = linear(keys[next(ki)], keys[next(ki)], 2 * d_hidden, d_hidden)
    params["w3"], params["b3"] = linear(keys[next(ki)], keys[next(ki)], d_hidden, 1)
    return params


def _round_up(x, m):
    return ((x + m - 1) // m) * m


def _default_tm():
    # 2048-row tiles on 128 MiB-VMEM parts (v5e/v6e); 1024 on v7x (64 MiB/TC).
    try:
        if pltpu.get_tpu_info().vmem_capacity_bytes >= (100 << 20):
            return 2048
    except Exception:
        pass  # non-TPU backend / API drift -> conservative default
    return 1024


def concat_model_forward(img, text, bow_celebrity, bow_caption, params, *, tm=None):
    """Fused ConcatModel forward.

    Inputs are consumed as-is (no HBM pad / dtype pass); the batch axis is
    gridded with a ragged last tile; weights & biases are VMEM-resident via
    constant index_maps; b3 (scalar) lives in SMEM.
    """
    B = img.shape[0]
    cdt = jnp.bfloat16  # MXU operand dtype (accumulation is f32)
    # NOTE: bf16 operands keep ~8 mantissa bits; if bag-of-words counts can
    # exceed ~256 in magnitude, keep first-layer operands f32 (drop the
    # in-kernel .astype and keep the branch weights in f32).

    # Batch tile: multiple of 8 (sublane); at least 2 grid steps when B allows
    # (so "parallel" uses both TCs on v7x); capped per-chip for VMEM.
    tm_cap = _default_tm() if tm is None else max(8, (tm // 8) * 8)
    two_step = _round_up(-(-_round_up(B, 8) // 2), 8)
    tm = max(8, min(tm_cap, two_step))
    num_tiles = -(-B // tm)

    # Weights: matmul operands in bf16, biases in f32. Final layer transposed
    # to a (1, 128) f32 row for the lane-reduction epilogue; b3 scalar -> SMEM.
    w_img = params["w_img"].astype(cdt)
    w_text = params["w_text"].astype(cdt)
    w_cel = params["w_cel"].astype(cdt)
    w_cap = params["w_cap"].astype(cdt)
    w1 = params["w1"].astype(cdt)
    w2 = params["w2"].astype(cdt)
    w3_row = params["w3"].T.astype(jnp.float32)            # (1, 128)
    b_img, b_text = params["b_img"], params["b_text"]
    b_cel, b_cap = params["b_cel"], params["b_cap"]
    b1, b2 = params["b1"], params["b2"]
    b3 = params["b3"].astype(jnp.float32)                   # (1, 1) -> SMEM

    def batch_spec(feat):
        return pl.BlockSpec((tm, feat), lambda i: (i, 0))

    def resident_spec(arr):
        return pl.BlockSpec(arr.shape, lambda i: (0, 0))

    smem_spec = pl.BlockSpec(memory_space=pltpu.MemorySpace.SMEM)

    args = (
        img, text, bow_celebrity, bow_caption,
        w_img, b_img, w_text, b_text, w_cel, b_cel, w_cap, b_cap,
        w1, b1, w2, b2, w3_row, b3,
    )
    in_specs = [
        batch_spec(512), batch_spec(768), batch_spec(512), batch_spec(256),
        resident_spec(w_img), resident_spec(b_img),
        resident_spec(w_text), resident_spec(b_text),
        resident_spec(w_cel), resident_spec(b_cel),
        resident_spec(w_cap), resident_spec(b_cap),
        resident_spec(w1), resident_spec(b1),
        resident_spec(w2), resident_spec(b2),
        resident_spec(w3_row), smem_spec,
    ]

    # Advisory cost estimate: lets XLA schedule neighbouring HLO (input
    # producers / output consumers) around this HBM-bound custom call.
    flops = 2 * B * (2048 * D_HIDDEN + 512 * 256 + 256 * 128 + 128)
    bytes_accessed = sum(int(a.size) * a.dtype.itemsize for a in args) + B * 4
    cost = pl.CostEstimate(flops=flops, transcendentals=0,
                           bytes_accessed=bytes_accessed)

    # Scoped VMEM: double-buffered f32 input tiles dominate (2 * TM * 2048 * 4B)
    # plus ~32 MiB headroom for weights / scratch / intermediates.
    vmem_limit = min(100 * 1024 * 1024, 2 * tm * 2048 * 4 + (32 << 20))

    out = pl.pallas_call(
        concat_model_kernel,
        out_shape=jax.ShapeDtypeStruct((B, 1), jnp.float32),
        grid=(num_tiles,),
        in_specs=in_specs,
        out_specs=pl.BlockSpec((tm, 1), lambda i: (i, 0)),
        scratch_shapes=[pltpu.VMEM((tm, 4 * D_HIDDEN), cdt)],
        compiler_params=pltpu.CompilerParams(
            dimension_semantics=("parallel",),   # shards grid steps across TCs
            vmem_limit_bytes=vmem_limit,
        ),
        cost_estimate=cost,
    )(*args)
    return out


def reference_forward(img, text, cel, cap, p):
    relu = lambda v: jnp.maximum(v, 0.0)
    h_img = relu(img @ p["w_img"] + p["b_img"])
    h_text = relu(text @ p["w_text"] + p["b_text"])
    h_cel = relu(cel @ p["w_cel"] + p["b_cel"])
    h_cap = relu(cap @ p["w_cap"] + p["b_cap"])
    h = jnp.concatenate([h_img, h_text, h_cel, h_cap], axis=-1)
    h1 = relu(h @ p["w1"] + p["b1"])
    h2 = relu(h1 @ p["w2"] + p["b2"])
    return h2 @ p["w3"] + p["b3"]


if __name__ == "__main__":
    key = jax.random.PRNGKey(0)
    k_img, k_text, k_cel, k_cap, k_params = jax.random.split(key, 5)

    B = 8
    img = jax.random.normal(k_img, (B, 512), jnp.float32)
    text = jax.random.normal(k_text, (B, 768), jnp.float32)
    bow_celebrity = jax.random.normal(k_cel, (B, 512), jnp.float32)
    bow_caption = jax.random.normal(k_cap, (B, 256), jnp.float32)

    params = make_params(k_params)

    out = concat_model_forward(img, text, bow_celebrity, bow_caption, params)
    out = jax.block_until_ready(out)

    ref = reference_forward(img, text, bow_celebrity, bow_caption, params)
    assert out.shape == (B, 1), out.shape
    # Kernel computes matmul operands in bf16 (f32 accumulation); reference is
    # full f32, hence the relaxed tolerance.
    assert jnp.allclose(out, ref, rtol=5e-2, atol=5e-2), "mismatch vs JAX reference"

    print("KERNEL_OK")
</pallas_src>

<mosaic_0001>
module attributes {stable_mosaic.version = 11 : i64} {
  func.func @concat_model_kernel(%arg0: i32, %arg1: memref<8x512xf32, #tpu.memory_space<vmem>>, %arg2: memref<8x768xf32, #tpu.memory_space<vmem>>, %arg3: memref<8x512xf32, #tpu.memory_space<vmem>>, %arg4: memref<8x256xf32, #tpu.memory_space<vmem>>, %arg5: memref<512x128xbf16, #tpu.memory_space<vmem>>, %arg6: memref<1x128xf32, #tpu.memory_space<vmem>>, %arg7: memref<768x128xbf16, #tpu.memory_space<vmem>>, %arg8: memref<1x128xf32, #tpu.memory_space<vmem>>, %arg9: memref<512x128xbf16, #tpu.memory_space<vmem>>, %arg10: memref<1x128xf32, #tpu.memory_space<vmem>>, %arg11: memref<256x128xbf16, #tpu.memory_space<vmem>>, %arg12: memref<1x128xf32, #tpu.memory_space<vmem>>, %arg13: memref<512x256xbf16, #tpu.memory_space<vmem>>, %arg14: memref<1x256xf32, #tpu.memory_space<vmem>>, %arg15: memref<256x128xbf16, #tpu.memory_space<vmem>>, %arg16: memref<1x128xf32, #tpu.memory_space<vmem>>, %arg17: memref<1x128xf32, #tpu.memory_space<vmem>>, %arg18: memref<1x1xf32, #tpu.memory_space<smem>>, %arg19: memref<8x1xf32, #tpu.memory_space<vmem>>, %arg20: memref<8x512xbf16, #tpu.memory_space<vmem>>) attributes {dimension_semantics = [#tpu.dimension_semantics<parallel>], iteration_bounds = array<i64: 1>, scalar_prefetch = 0 : i64, scratch_operands = 1 : i64, tpu.core_type = #tpu.core_type<tc>, window_params = [{transform_indices = @transform_0, window_bounds = array<i64: 8, 512>}, {transform_indices = @transform_1, window_bounds = array<i64: 8, 768>}, {transform_indices = @transform_2, window_bounds = array<i64: 8, 512>}, {transform_indices = @transform_3, window_bounds = array<i64: 8, 256>}, {pipeline_mode = #tpu.pipeline_mode<synchronous>, transform_indices = @transform_4, window_bounds = array<i64: 512, 128>}, {pipeline_mode = #tpu.pipeline_mode<synchronous>, transform_indices = @transform_5, window_bounds = array<i64: 1, 128>}, {pipeline_mode = #tpu.pipeline_mode<synchronous>, transform_indices = @transform_6, window_bounds = array<i64: 768, 128>}, {pipeline_mode = #tpu.pipeline_mode<synchronous>, transform_indices = @transform_7, window_bounds = array<i64: 1, 128>}, {pipeline_mode = #tpu.pipeline_mode<synchronous>, transform_indices = @transform_8, window_bounds = array<i64: 512, 128>}, {pipeline_mode = #tpu.pipeline_mode<synchronous>, transform_indices = @transform_9, window_bounds = array<i64: 1, 128>}, {pipeline_mode = #tpu.pipeline_mode<synchronous>, transform_indices = @transform_10, window_bounds = array<i64: 256, 128>}, {pipeline_mode = #tpu.pipeline_mode<synchronous>, transform_indices = @transform_11, window_bounds = array<i64: 1, 128>}, {pipeline_mode = #tpu.pipeline_mode<synchronous>, transform_indices = @transform_12, window_bounds = array<i64: 512, 256>}, {pipeline_mode = #tpu.pipeline_mode<synchronous>, transform_indices = @transform_13, window_bounds = array<i64: 1, 256>}, {pipeline_mode = #tpu.pipeline_mode<synchronous>, transform_indices = @transform_14, window_bounds = array<i64: 256, 128>}, {pipeline_mode = #tpu.pipeline_mode<synchronous>, transform_indices = @transform_15, window_bounds = array<i64: 1, 128>}, {pipeline_mode = #tpu.pipeline_mode<synchronous>, transform_indices = @transform_16, window_bounds = array<i64: 1, 128>}, {transform_indices = @transform_17, window_bounds = array<i64: 1, 1>}, {transform_indices = @transform_18, window_bounds = array<i64: 8, 1>}]} {
    %c0 = arith.constant 0 : index
    %c0_0 = arith.constant 0 : index
    %0 = vector.load %arg1[%c0, %c0_0] : memref<8x512xf32, #tpu.memory_space<vmem>>, vector<8x512xf32>
    %1 = arith.truncf %0 : vector<8x512xf32> to vector<8x512xbf16>
    %c0_1 = arith.constant 0 : index
    %c0_2 = arith.constant 0 : index
    %2 = vector.load %arg5[%c0_1, %c0_2] : memref<512x128xbf16, #tpu.memory_space<vmem>>, vector<512x128xbf16>
    %cst = arith.constant dense<0.000000e+00> : vector<8x128xf32>
    %3 = tpu.matmul %1, %2, %cst {dimension_numbers = #tpu.dot_dimension_numbers<[1], [0], [0], [1], [0, 0, 1, 1], [], []>} : vector<8x512xbf16>, vector<512x128xbf16>, vector<8x128xf32> -> vector<8x128xf32>
    %c0_3 = arith.constant 0 : index
    %c0_4 = arith.constant 0 : index
    %4 = vector.load %arg6[%c0_3, %c0_4] : memref<1x128xf32, #tpu.memory_space<vmem>>, vector<1x128xf32>
    %5 = vector.broadcast %4 : vector<1x128xf32> to vector<8x128xf32>
    %6 = arith.addf %3, %5 : vector<8x128xf32>
    %cst_5 = arith.constant 0.000000e+00 : f32
    %7 = vector.broadcast %cst_5 : f32 to vector<8x128xf32>
    %8 = arith.maximumf %6, %7 : vector<8x128xf32>
    %c0_6 = arith.constant 0 : index
    %c0_7 = arith.constant 0 : index
    %9 = vector.load %arg2[%c0_6, %c0_7] : memref<8x768xf32, #tpu.memory_space<vmem>>, vector<8x768xf32>
    %10 = arith.truncf %9 : vector<8x768xf32> to vector<8x768xbf16>
    %c0_8 = arith.constant 0 : index
    %c0_9 = arith.constant 0 : index
    %11 = vector.load %arg7[%c0_8, %c0_9] : memref<768x128xbf16, #tpu.memory_space<vmem>>, vector<768x128xbf16>
    %cst_10 = arith.constant dense<0.000000e+00> : vector<8x128xf32>
    %12 = tpu.matmul %10, %11, %cst_10 {dimension_numbers = #tpu.dot_dimension_numbers<[1], [0], [0], [1], [0, 0, 1, 1], [], []>} : vector<8x768xbf16>, vector<768x128xbf16>, vector<8x128xf32> -> vector<8x128xf32>
    %c0_11 = arith.constant 0 : index
    %c0_12 = arith.constant 0 : index
    %13 = vector.load %arg8[%c0_11, %c0_12] : memref<1x128xf32, #tpu.memory_space<vmem>>, vector<1x128xf32>
    %14 = vector.broadcast %13 : vector<1x128xf32> to vector<8x128xf32>
    %15 = arith.addf %12, %14 : vector<8x128xf32>
    %cst_13 = arith.constant 0.000000e+00 : f32
    %16 = vector.broadcast %cst_13 : f32 to vector<8x128xf32>
    %17 = arith.maximumf %15, %16 : vector<8x128xf32>
    %c0_14 = arith.constant 0 : index
    %c0_15 = arith.constant 0 : index
    %18 = vector.load %arg3[%c0_14, %c0_15] : memref<8x512xf32, #tpu.memory_space<vmem>>, vector<8x512xf32>
    %19 = arith.truncf %18 : vector<8x512xf32> to vector<8x512xbf16>
    %c0_16 = arith.constant 0 : index
    %c0_17 = arith.constant 0 : index
    %20 = vector.load %arg9[%c0_16, %c0_17] : memref<512x128xbf16, #tpu.memory_space<vmem>>, vector<512x128xbf16>
    %cst_18 = arith.constant dense<0.000000e+00> : vector<8x128xf32>
    %21 = tpu.matmul %19, %20, %cst_18 {dimension_numbers = #tpu.dot_dimension_numbers<[1], [0], [0], [1], [0, 0, 1, 1], [], []>} : vector<8x512xbf16>, vector<512x128xbf16>, vector<8x128xf32> -> vector<8x128xf32>
    %c0_19 = arith.constant 0 : index
    %c0_20 = arith.constant 0 : index
    %22 = vector.load %arg10[%c0_19, %c0_20] : memref<1x128xf32, #tpu.memory_space<vmem>>, vector<1x128xf32>
    %23 = vector.broadcast %22 : vector<1x128xf32> to vector<8x128xf32>
    %24 = arith.addf %21, %23 : vector<8x128xf32>
    %cst_21 = arith.constant 0.000000e+00 : f32
    %25 = vector.broadcast %cst_21 : f32 to vector<8x128xf32>
    %26 = arith.maximumf %24, %25 : vector<8x128xf32>
    %c0_22 = arith.constant 0 : index
    %c0_23 = arith.constant 0 : index
    %27 = vector.load %arg4[%c0_22, %c0_23] : memref<8x256xf32, #tpu.memory_space<vmem>>, vector<8x256xf32>
    %28 = arith.truncf %27 : vector<8x256xf32> to vector<8x256xbf16>
    %c0_24 = arith.constant 0 : index
    %c0_25 = arith.constant 0 : index
    %29 = vector.load %arg11[%c0_24, %c0_25] : memref<256x128xbf16, #tpu.memory_space<vmem>>, vector<256x128xbf16>
    %cst_26 = arith.constant dense<0.000000e+00> : vector<8x128xf32>
    %30 = tpu.matmul %28, %29, %cst_26 {dimension_numbers = #tpu.dot_dimension_numbers<[1], [0], [0], [1], [0, 0, 1, 1], [], []>} : vector<8x256xbf16>, vector<256x128xbf16>, vector<8x128xf32> -> vector<8x128xf32>
    %c0_27 = arith.constant 0 : index
    %c0_28 = arith.constant 0 : index
    %31 = vector.load %arg12[%c0_27, %c0_28] : memref<1x128xf32, #tpu.memory_space<vmem>>, vector<1x128xf32>
    %32 = vector.broadcast %31 : vector<1x128xf32> to vector<8x128xf32>
    %33 = arith.addf %30, %32 : vector<8x128xf32>
    %cst_29 = arith.constant 0.000000e+00 : f32
    %34 = vector.broadcast %cst_29 : f32 to vector<8x128xf32>
    %35 = arith.maximumf %33, %34 : vector<8x128xf32>
    %36 = arith.truncf %8 : vector<8x128xf32> to vector<8x128xbf16>
    %c0_30 = arith.constant 0 : index
    %c0_31 = arith.constant 0 : index
    %37 = vector.load %arg20[%c0_30, %c0_31] : memref<8x512xbf16, #tpu.memory_space<vmem>>, vector<8x128xbf16>
    tpu.vector_store %arg20[%c0_30, %c0_31], %36 {strides = array<i32>} : memref<8x512xbf16, #tpu.memory_space<vmem>>, vector<8x128xbf16>,
    %38 = arith.truncf %17 : vector<8x128xf32> to vector<8x128xbf16>
    %c0_32 = arith.constant 0 : index
    %c128 = arith.constant 128 : index
    %39 = vector.load %arg20[%c0_32, %c128] : memref<8x512xbf16, #tpu.memory_space<vmem>>, vector<8x128xbf16>
    tpu.vector_store %arg20[%c0_32, %c128], %38 {strides = array<i32>} : memref<8x512xbf16, #tpu.memory_space<vmem>>, vector<8x128xbf16>,
    %40 = arith.truncf %26 : vector<8x128xf32> to vector<8x128xbf16>
    %c0_33 = arith.constant 0 : index
    %c256 = arith.constant 256 : index
    %41 = vector.load %arg20[%c0_33, %c256] : memref<8x512xbf16, #tpu.memory_space<vmem>>, vector<8x128xbf16>
    tpu.vector_store %arg20[%c0_33, %c256], %40 {strides = array<i32>} : memref<8x512xbf16, #tpu.memory_space<vmem>>, vector<8x128xbf16>,
    %42 = arith.truncf %35 : vector<8x128xf32> to vector<8x128xbf16>
    %c0_34 = arith.constant 0 : index
    %c384 = arith.constant 384 : index
    %43 = vector.load %arg20[%c0_34, %c384] : memref<8x512xbf16, #tpu.memory_space<vmem>>, vector<8x128xbf16>
    tpu.vector_store %arg20[%c0_34, %c384], %42 {strides = array<i32>} : memref<8x512xbf16, #tpu.memory_space<vmem>>, vector<8x128xbf16>,
    %c0_35 = arith.constant 0 : index
    %c0_36 = arith.constant 0 : index
    %44 = vector.load %arg20[%c0_35, %c0_36] : memref<8x512xbf16, #tpu.memory_space<vmem>>, vector<8x512xbf16>
    %c0_37 = arith.constant 0 : index
    %c0_38 = arith.constant 0 : index
    %45 = vector.load %arg13[%c0_37, %c0_38] : memref<512x256xbf16, #tpu.memory_space<vmem>>, vector<512x256xbf16>
    %cst_39 = arith.constant dense<0.000000e+00> : vector<8x256xf32>
    %46 = tpu.matmul %44, %45, %cst_39 {dimension_numbers = #tpu.dot_dimension_numbers<[1], [0], [0], [1], [0, 0, 1, 1], [], []>} : vector<8x512xbf16>, vector<512x256xbf16>, vector<8x256xf32> -> vector<8x256xf32>
    %c0_40 = arith.constant 0 : index
    %c0_41 = arith.constant 0 : index
    %47 = vector.load %arg14[%c0_40, %c0_41] : memref<1x256xf32, #tpu.memory_space<vmem>>, vector<1x256xf32>
    %48 = vector.broadcast %47 : vector<1x256xf32> to vector<8x256xf32>
    %49 = arith.addf %46, %48 : vector<8x256xf32>
    %cst_42 = arith.constant 0.000000e+00 : f32
    %50 = vector.broadcast %cst_42 : f32 to vector<8x256xf32>
    %51 = arith.maximumf %49, %50 : vector<8x256xf32>
    %52 = arith.truncf %51 : vector<8x256xf32> to vector<8x256xbf16>
    %c0_43 = arith.constant 0 : index
    %c0_44 = arith.constant 0 : index
    %53 = vector.load %arg15[%c0_43, %c0_44] : memref<256x128xbf16, #tpu.memory_space<vmem>>, vector<256x128xbf16>
    %cst_45 = arith.constant dense<0.000000e+00> : vector<8x128xf32>
    %54 = tpu.matmul %52, %53, %cst_45 {dimension_numbers = #tpu.dot_dimension_numbers<[1], [0], [0], [1], [0, 0, 1, 1], [], []>} : vector<8x256xbf16>, vector<256x128xbf16>, vector<8x128xf32> -> vector<8x128xf32>
    %c0_46 = arith.constant 0 : index
    %c0_47 = arith.constant 0 : index
    %55 = vector.load %arg16[%c0_46, %c0_47] : memref<1x128xf32, #tpu.memory_space<vmem>>, vector<1x128xf32>
    %56 = vector.broadcast %55 : vector<1x128xf32> to vector<8x128xf32>
    %57 = arith.addf %54, %56 : vector<8x128xf32>
    %cst_48 = arith.constant 0.000000e+00 : f32
    %58 = vector.broadcast %cst_48 : f32 to vector<8x128xf32>
    %59 = arith.maximumf %57, %58 : vector<8x128xf32>
    %c0_49 = arith.constant 0 : index
    %c0_50 = arith.constant 0 : index
    %60 = vector.load %arg17[%c0_49, %c0_50] : memref<1x128xf32, #tpu.memory_space<vmem>>, vector<1x128xf32>
    %61 = vector.broadcast %60 : vector<1x128xf32> to vector<8x128xf32>
    %62 = arith.mulf %59, %61 : vector<8x128xf32>
    %cst_51 = arith.constant dense<0.000000e+00> : vector<8xf32>
    %63 = vector.multi_reduction <add>, %62, %cst_51 [1] : vector<8x128xf32> to vector<8xf32>
    %64 = vector.shape_cast %63 : vector<8xf32> to vector<8x1xf32>
    %c0_52 = arith.constant 0 : index
    %c0_53 = arith.constant 0 : index
    %65 = memref.load %arg18[%c0_52, %c0_53] : memref<1x1xf32, #tpu.memory_space<smem>>
    %66 = vector.broadcast %65 : f32 to vector<8x1xf32>
    %67 = arith.addf %64, %66 : vector<8x1xf32>
    %c0_54 = arith.constant 0 : index
    %c0_55 = arith.constant 0 : index
    %68 = vector.load %arg19[%c0_54, %c0_55] : memref<8x1xf32, #tpu.memory_space<vmem>>, vector<8x1xf32>
    tpu.vector_store %arg19[%c0_54, %c0_55], %67 {strides = array<i32>} : memref<8x1xf32, #tpu.memory_space<vmem>>, vector<8x1xf32>,
    return
  }
  func.func @transform_0(%arg0: i32) -> (i32, i32) {
    %c0_i32 = arith.constant 0 : i32
    %c0_i32_0 = arith.constant 0 : i32
    return %arg0, %c0_i32 : i32, i32
  }
  func.func @transform_1(%arg0: i32) -> (i32, i32) {
    %c0_i32 = arith.constant 0 : i32
    %c0_i32_0 = arith.constant 0 : i32
    return %arg0, %c0_i32 : i32, i32
  }
  func.func @transform_2(%arg0: i32) -> (i32, i32) {
    %c0_i32 = arith.constant 0 : i32
    %c0_i32_0 = arith.constant 0 : i32
    return %arg0, %c0_i32 : i32, i32
  }
  func.func @transform_3(%arg0: i32) -> (i32, i32) {
    %c0_i32 = arith.constant 0 : i32
    %c0_i32_0 = arith.constant 0 : i32
    return %arg0, %c0_i32 : i32, i32
  }
  func.func @transform_4(%arg0: i32) -> (i32, i32) {
    %c0_i32 = arith.constant 0 : i32
    %c0_i32_0 = arith.constant 0 : i32
    %c0_i32_1 = arith.constant 0 : i32
    return %c0_i32, %c0_i32_0 : i32, i32
  }
  func.func @transform_5(%arg0: i32) -> (i32, i32) {
    %c0_i32 = arith.constant 0 : i32
    %c0_i32_0 = arith.constant 0 : i32
    %c0_i32_1 = arith.constant 0 : i32
    return %c0_i32, %c0_i32_0 : i32, i32
  }
  func.func @transform_6(%arg0: i32) -> (i32, i32) {
    %c0_i32 = arith.constant 0 : i32
    %c0_i32_0 = arith.constant 0 : i32
    %c0_i32_1 = arith.constant 0 : i32
    return %c0_i32, %c0_i32_0 : i32, i32
  }
  func.func @transform_7(%arg0: i32) -> (i32, i32) {
    %c0_i32 = arith.constant 0 : i32
    %c0_i32_0 = arith.constant 0 : i32
    %c0_i32_1 = arith.constant 0 : i32
    return %c0_i32, %c0_i32_0 : i32, i32
  }
  func.func @transform_8(%arg0: i32) -> (i32, i32) {
    %c0_i32 = arith.constant 0 : i32
    %c0_i32_0 = arith.constant 0 : i32
    %c0_i32_1 = arith.constant 0 : i32
    return %c0_i32, %c0_i32_0 : i32, i32
  }
  func.func @transform_9(%arg0: i32) -> (i32, i32) {
    %c0_i32 = arith.constant 0 : i32
    %c0_i32_0 = arith.constant 0 : i32
    %c0_i32_1 = arith.constant 0 : i32
    return %c0_i32, %c0_i32_0 : i32, i32
  }
  func.func @transform_10(%arg0: i32) -> (i32, i32) {
    %c0_i32 = arith.constant 0 : i32
    %c0_i32_0 = arith.constant 0 : i32
    %c0_i32_1 = arith.constant 0 : i32
    return %c0_i32, %c0_i32_0 : i32, i32
  }
  func.func @transform_11(%arg0: i32) -> (i32, i32) {
    %c0_i32 = arith.constant 0 : i32
    %c0_i32_0 = arith.constant 0 : i32
    %c0_i32_1 = arith.constant 0 : i32
    return %c0_i32, %c0_i32_0 : i32, i32
  }
  func.func @transform_12(%arg0: i32) -> (i32, i32) {
    %c0_i32 = arith.constant 0 : i32
    %c0_i32_0 = arith.constant 0 : i32
    %c0_i32_1 = arith.constant 0 : i32
    return %c0_i32, %c0_i32_0 : i32, i32
  }
  func.func @transform_13(%arg0: i32) -> (i32, i32) {
    %c0_i32 = arith.constant 0 : i32
    %c0_i32_0 = arith.constant 0 : i32
    %c0_i32_1 = arith.constant 0 : i32
    return %c0_i32, %c0_i32_0 : i32, i32
  }
  func.func @transform_14(%arg0: i32) -> (i32, i32) {
    %c0_i32 = arith.constant 0 : i32
    %c0_i32_0 = arith.constant 0 : i32
    %c0_i32_1 = arith.constant 0 : i32
    return %c0_i32, %c0_i32_0 : i32, i32
  }
  func.func @transform_15(%arg0: i32) -> (i32, i32) {
    %c0_i32 = arith.constant 0 : i32
    %c0_i32_0 = arith.constant 0 : i32
    %c0_i32_1 = arith.constant 0 : i32
    return %c0_i32, %c0_i32_0 : i32, i32
  }
  func.func @transform_16(%arg0: i32) -> (i32, i32) {
    %c0_i32 = arith.constant 0 : i32
    %c0_i32_0 = arith.constant 0 : i32
    %c0_i32_1 = arith.constant 0 : i32
    return %c0_i32, %c0_i32_0 : i32, i32
  }
  func.func @transform_17(%arg0: i32) -> (i32, i32) {
    %c0_i32 = arith.constant 0 : i32
    %c0_i32_0 = arith.constant 0 : i32
    %c0_i32_1 = arith.constant 0 : i32
    return %c0_i32, %c0_i32_0 : i32, i32
  }
  func.func @transform_18(%arg0: i32) -> (i32, i32) {
    %c0_i32 = arith.constant 0 : i32
    %c0_i32_0 = arith.constant 0 : i32
    return %arg0, %c0_i32 : i32, i32
  }
}

</mosaic_0001>

<bundles_post_ra>
// kernel: tpu_custom_call.1
= control target key start
LH: loop header
LB: loop body
LE: loop exit
PB: predicated region body
PF: predicated region fallthrough
CT: control target
= control target key end

     0   :  { %s3382_s0 = inlined_call_operand.hbm [shape: f32[8,512], index: 0, kind: input, shape index: {}]   ;;  %s3383_s1 = inlined_call_operand.hbm [shape: f32[8,768], index: 1, kind: input, shape index: {}]   ;;  %s3384_s2 = inlined_call_operand.hbm [shape: f32[8,512], index: 2, kind: input, shape index: {}]   ;;  %s3385_s3 = inlined_call_operand.hbm [shape: f32[8,256], index: 3, kind: input, shape index: {}]   ;;  %s3386_s4 = inlined_call_operand.hbm [shape: bf16[512,128], index: 4, kind: input, shape index: {}]   ;;  %s3387_s5 = inlined_call_operand.vmem [shape: f32[1,128], index: 5, kind: input, shape index: {}]   ;;  %s3388_s6 = inlined_call_operand.hbm [shape: bf16[768,128], index: 6, kind: input, shape index: {}]   ;;  %s3389_s7 = inlined_call_operand.vmem [shape: f32[1,128], index: 7, kind: input, shape index: {}]   ;;  %s3390_s8 = inlined_call_operand.hbm [shape: bf16[512,128], index: 8, kind: input, shape index: {}]   ;;  %s3391_s9 = inlined_call_operand.vmem [shape: f32[1,128], index: 9, kind: input, shape index: {}]   ;;  %s3392_s10 = inlined_call_operand.hbm [shape: bf16[256,128], index: 10, kind: input, shape index: {}]   ;;  %s3393_s11 = inlined_call_operand.vmem [shape: f32[1,128], index: 11, kind: input, shape index: {}]   ;;  %s3394_s12 = inlined_call_operand.hbm [shape: bf16[512,256], index: 12, kind: input, shape index: {}]   ;;  %s3395_s13 = inlined_call_operand.vmem [shape: f32[1,256], index: 13, kind: input, shape index: {}]   ;;  %s3396_s14 = inlined_call_operand.hbm [shape: bf16[256,128], index: 14, kind: input, shape index: {}]   ;;  %s3397_s15 = inlined_call_operand.vmem [shape: f32[1,128], index: 15, kind: input, shape index: {}]   ;;  %s3398_s16 = inlined_call_operand.vmem [shape: f32[1,128], index: 16, kind: input, shape index: {}]   ;;  %s3399_s17 = inlined_call_operand.<no memory space> [shape: f32[1,1], index: 17, kind: input, shape index: {}]   ;;  %s3400_s18 = inlined_call_operand.vmem [shape: f32[8,1], index: 18, kind: output, shape index: {}]  }
   0x1   :  { %3401 = sst [smem:[#allocation26_spill]] %s3382_s0 }
   0x2   :  { %3402 = sst [smem:[#allocation27_spill]] %s3383_s1 }
   0x3   :  { %3403 = sst [smem:[#allocation28_spill]] %s3384_s2 }
   0x4   :  { %24 = vsyncpa [#allocation5], 0 }
   0x5   :  { %25 = vsyncpa [#allocation7], 0 }
   0x6   :  { %26 = vsyncpa [#allocation10], 0 }
   0x7   :  { %27 = vsyncpa [#allocation13], 0 }
   0x8   :  { %28 = vsyncpa [#allocation16], 0 }
   0x9   :  { %29 = vsyncpa [#allocation19], 0  ;;  %s3201_s27 = smov [#allocation6]   ;;  %s3202_s29 = smov [#allocation9]  }
   0xa   :  { %s46_s28 = sshll.u32 %s3201_s27, 4  ;;  %s66_s30 = sshll.u32 %s3202_s29, 4  ;;  %s47_s28 = int_to_ptr.vmem [resolvable:$true] %s46_s28  ;;  %s67_s30 = int_to_ptr.vmem [resolvable:$true] %s66_s30 }
   0xb   :  { %s2997_s0 = scalar_lea.vmem %s47_s28, 768  ;;  %p3002_p1 = scmp.lt.s32.totalorder %s47_s28, %s47_s28 }
   0xc   :  { %p2998_p0 = scmp.ne.s32.totalorder %s47_s28, %s2997_s0  ;;  %p3003_p2 = scmp.lt.s32.totalorder %s2997_s0, %s2997_s0 }
   0xe   :  { %p3004_p3 = por %p3003_p2, %p3002_p1 }
  0x10   :  { %p3005_p4 = pnand %p3004_p3, %p2998_p0 }
  0x12   :  { %3008 = shalt.err (!%p3005_p4)
}
  0x13   :  { %s3404_s20 = sld [smem:[#allocation27_spill]]  ;;  %s3017_s21 = scalar_lea.vmem %s67_s30, 256 }
  0x14   :  { %p3018_p5 = scmp.ne.s32.totalorder %s67_s30, %s3017_s21  ;;  %p3022_p6 = scmp.lt.s32.totalorder %s67_s30, %s67_s30 }
  0x15   :  { %p3023_p7 = scmp.lt.s32.totalorder %s3017_s21, %s3017_s21 }
  0x17   :  { %p3024_p8 = por %p3023_p7, %p3022_p6 }
  0x19   :  { %49 = dma.hbm_to_vmem [thread:$0]  %s3404_s20, 768, %s47_s28, [#allocation7]  }
  0x1a   :  { %p3025_p9 = pnand %p3024_p8, %p3018_p5 }
  0x1c   :  { %3028 = shalt.err (!%p3025_p9)
}
  0x1d   :  { %69 = dma.hbm_to_vmem [thread:$0]  %s3385_s3, 256, %s67_s30, [#allocation10]  }
  0x1e   :  { %s3203_s23 = smov [#allocation12]   ;;  %s3204_s25 = smov [#allocation15]  }
  0x1f   :  { %s89_s24 = sshll.u32 %s3203_s23, 4  ;;  %s117_s26 = sshll.u32 %s3204_s25, 4  ;;  %s90_s24 = int_to_ptr.vmem [resolvable:$true] %s89_s24  ;;  %s118_s26 = int_to_ptr.vmem [resolvable:$true] %s117_s26 }
  0x20   :  { %s3037_s27 = scalar_lea.vmem %s90_s24, 6144  ;;  %p3042_p11 = scmp.lt.s32.totalorder %s90_s24, %s90_s24 }
  0x21   :  { %p3038_p10 = scmp.ne.s32.totalorder %s90_s24, %s3037_s27  ;;  %p3043_p12 = scmp.lt.s32.totalorder %s3037_s27, %s3037_s27 }
  0x23   :  { %p3044_p13 = por %p3043_p12, %p3042_p11 }
  0x25   :  { %p3045_p0 = pnand %p3044_p13, %p3038_p10 }
  0x27   :  { %3048 = shalt.err (!%p3045_p0)
}
  0x28   :  { %s3205_s28 = smov 64   ;;  %s3206_s29 = smov 4  }
  0x29   :  { %95 = dma.hbm_to_vmem [thread:$0]  %s3388_s6, 6144, %s90_s24, [#allocation13], %s3205_s28, %s3205_s28, %s3206_s29  }
  0x2a   :  { %s3057_s30 = scalar_lea.vmem %s118_s26, 2048  ;;  %p3062_p2 = scmp.lt.s32.totalorder %s118_s26, %s118_s26 }
  0x2b   :  { %p3058_p1 = scmp.ne.s32.totalorder %s118_s26, %s3057_s30  ;;  %p3063_p3 = scmp.lt.s32.totalorder %s3057_s30, %s3057_s30 }
  0x2d   :  { %p3064_p4 = por %p3063_p3, %p3062_p2 }
  0x2f   :  { %p3065_p5 = pnand %p3064_p4, %p3058_p1 }
  0x31   :  { %3068 = shalt.err (!%p3065_p5)
}
  0x32   :  { %123 = dma.hbm_to_vmem [thread:$0]  %s3392_s10, 2048, %s118_s26, [#allocation16], %s3205_s28, %s3205_s28, %s3206_s29  }
  0x33   :  { %s3207_s20 = smov [#allocation4]   ;;  %s3208_s22 = smov [#allocation8]  }
  0x34   :  { %s36_s21 = sshll.u32 %s3207_s20, 4  ;;  %s56_s2 = sshll.u32 %s3208_s22, 4  ;;  %s37_s21 = int_to_ptr.vmem [resolvable:$true] %s36_s21  ;;  %s57_s2 = int_to_ptr.vmem [resolvable:$true] %s56_s2 }
  0x35   :  { %s3077_s6 = scalar_lea.vmem %s37_s21, 512  ;;  %p3082_p7 = scmp.lt.s32.totalorder %s37_s21, %s37_s21 }
  0x36   :  { %p3078_p6 = scmp.ne.s32.totalorder %s37_s21, %s3077_s6  ;;  %p3083_p8 = scmp.lt.s32.totalorder %s3077_s6, %s3077_s6 }
  0x38   :  { %p3084_p9 = por %p3083_p8, %p3082_p7 }
  0x3a   :  { %p3085_p10 = pnand %p3084_p9, %p3078_p6 }
  0x3c   :  { %3088 = shalt.err (!%p3085_p10)
}
  0x3d   :  { %s3405_s25 = sld [smem:[#allocation26_spill]]  ;;  %s3097_s27 = scalar_lea.vmem %s57_s2, 512 }
  0x3e   :  { %p3098_p11 = scmp.ne.s32.totalorder %s57_s2, %s3097_s27  ;;  %p3102_p12 = scmp.lt.s32.totalorder %s57_s2, %s57_s2 }
  0x3f   :  { %p3103_p13 = scmp.lt.s32.totalorder %s3097_s27, %s3097_s27 }
  0x41   :  { %p3104_p0 = por %p3103_p13, %p3102_p12 }
  0x43   :  { %39 = dma.hbm_to_vmem [thread:$0]  %s3405_s25, 512, %s37_s21, [#allocation5]  }
  0x44   :  { %p3105_p1 = pnand %p3104_p0, %p3098_p11 }
  0x46   :  { %3108 = shalt.err (!%p3105_p1)
}
  0x47   :  { %s3406_s0 = sld [smem:[#allocation28_spill]]  ;;  %s3209_s3 = smov [#allocation11]  }
  0x48   :  { %s75_s30 = sshll.u32 %s3209_s3, 4  ;;  %s3210_s19 = smov [#allocation14]   ;;  %s76_s30 = int_to_ptr.vmem [resolvable:$true] %s75_s30 }
  0x49   :  { %s103_s1 = sshll.u32 %s3210_s19, 4  ;;  %s3117_s20 = scalar_lea.vmem %s76_s30, 4096  ;;  %s104_s1 = int_to_ptr.vmem [resolvable:$true] %s103_s1 }
  0x4a   :  { %p3118_p2 = scmp.ne.s32.totalorder %s76_s30, %s3117_s20  ;;  %p3122_p3 = scmp.lt.s32.totalorder %s76_s30, %s76_s30 }
  0x4b   :  { %p3123_p4 = scmp.lt.s32.totalorder %s3117_s20, %s3117_s20 }
  0x4d   :  { %59 = dma.hbm_to_vmem [thread:$0]  %s3406_s0, 512, %s57_s2, [#allocation7]  }
  0x4e   :  { %p3124_p5 = por %p3123_p4, %p3122_p3 }
  0x50   :  { %p3125_p6 = pnand %p3124_p5, %p3118_p2 }
  0x52   :  { %3128 = shalt.err (!%p3125_p6)
}
  0x53   :  { %81 = dma.hbm_to_vmem [thread:$0]  %s3386_s4, 4096, %s76_s30, [#allocation10], %s3205_s28, %s3205_s28, %s3206_s29  }
  0x54   :  { %s3137_s2 = scalar_lea.vmem %s104_s1, 4096  ;;  %p3142_p8 = scmp.lt.s32.totalorder %s104_s1, %s104_s1 }
  0x55   :  { %p3138_p7 = scmp.ne.s32.totalorder %s104_s1, %s3137_s2  ;;  %p3143_p9 = scmp.lt.s32.totalorder %s3137_s2, %s3137_s2 }
  0x57   :  { %p3144_p10 = por %p3143_p9, %p3142_p8 }
  0x59   :  { %p3145_p11 = pnand %p3144_p10, %p3138_p7 }
  0x5b   :  { %3148 = shalt.err (!%p3145_p11)
}
  0x5c   :  { %109 = dma.hbm_to_vmem [thread:$0]  %s3390_s8, 4096, %s104_s1, [#allocation13], %s3205_s28, %s3205_s28, %s3206_s29  }
  0x5d   :  { %s3211_s24 = smov [#allocation17]  }
  0x5e   :  { %s131_s25 = sshll.u32 %s3211_s24, 4  ;;  %s132_s25 = int_to_ptr.vmem [resolvable:$true] %s131_s25 }
  0x5f   :  { %s3157_s27 = scalar_lea.vmem %s132_s25, 8192  ;;  %p3162_p13 = scmp.lt.s32.totalorder %s132_s25, %s132_s25 }
  0x60   :  { %p3158_p12 = scmp.ne.s32.totalorder %s132_s25, %s3157_s27  ;;  %p3163_p0 = scmp.lt.s32.totalorder %s3157_s27, %s3157_s27 }
  0x62   :  { %p3164_p1 = por %p3163_p0, %p3162_p13 }
  0x64   :  { %p3165_p2 = pnand %p3164_p1, %p3158_p12 }
  0x66   :  { %3168 = shalt.err (!%p3165_p2)
}
  0x67   :  { %s3212_s4 = smov 128   ;;  %s3213_s10 = smov 8  }
  0x68   :  { %137 = dma.hbm_to_vmem [thread:$0]  %s3394_s12, 8192, %s132_s25, [#allocation16], %s3212_s4, %s3212_s4, %s3213_s10  }
  0x69   :  { %s3214_s3 = smov [#allocation18]  }
  0x6a   :  { %s145_s30 = sshll.u32 %s3214_s3, 4  ;;  %s146_s30 = int_to_ptr.vmem [resolvable:$true] %s145_s30 }
  0x6b   :  { %s3177_s8 = scalar_lea.vmem %s146_s30, 2048  ;;  %p3182_p4 = scmp.lt.s32.totalorder %s146_s30, %s146_s30 }
  0x6c   :  { %p3178_p3 = scmp.ne.s32.totalorder %s146_s30, %s3177_s8  ;;  %p3183_p5 = scmp.lt.s32.totalorder %s3177_s8, %s3177_s8 }
  0x6e   :  { %p3184_p6 = por %p3183_p5, %p3182_p4 }
  0x70   :  { %p3185_p7 = pnand %p3184_p6, %p3178_p3 }
  0x72   :  { %3188 = shalt.err (!%p3185_p7)
}
  0x73   :  { %151 = dma.hbm_to_vmem [thread:$0]  %s3396_s14, 2048, %s146_s30, [#allocation19], %s3205_s28, %s3205_s28, %s3206_s29  }
  0x74   :  { %3189 = dma.done.wait [#allocation5], 512  }
  0x75   :  { %3190 = vsyncadd [#allocation5], 4294966784 }
  0x76   :  { %3191 = dma.done.wait [#allocation7], 1280  }
  0x77   :  { %3192 = vsyncadd [#allocation7], 4294966016 }
  0x78   :  { %3193 = dma.done.wait [#allocation10], 4352  }
  0x79   :  { %3194 = vsyncadd [#allocation10], 4294962944 }
  0x7a   :  { %3195 = dma.done.wait [#allocation13], 10240  }
  0x7b   :  { %3196 = vsyncadd [#allocation13], 4294957056 }
  0x7c   :  { %3197 = dma.done.wait [#allocation16], 10240  }
  0x7d   :  { %3198 = vsyncadd [#allocation16], 4294957056 }
  0x7e   :  { %3199 = dma.done.wait [#allocation19], 2048  }
  0x7f   :  { %3200 = vsyncadd [#allocation19], 4294965248  ;;  %v2749_v0 = vld [vmem:[#allocation11 + $0x78] sm:$0xff]   ;;  %v2753_v4 = vld [vmem:[#allocation11 + $0x70] sm:$0xff]   ;;  %vm2292_vm0 = vcmask 7168  }
  0x80   :  { %v2750_v1 = vld [vmem:[#allocation11 + $0xf8] sm:$0xff]   ;;  %2537 = vmatprep.subr.bf16.mxu0 %v2749_v0  ;;  %v2754_v5 = vld [vmem:[#allocation11 + $0xf0] sm:$0xff]   ;;  %v2757_v8 = vld [vmem:[#allocation11 + $0x68] sm:$0xff]  }
  0x81   :  { %v2751_v2 = vld [vmem:[#allocation11 + $0x38] sm:$0xff]   ;;  %2559 = vmatprep.subr.bf16.mxu1 %v2750_v1  ;;  %v2755_v6 = vld [vmem:[#allocation11 + $0x30] sm:$0xff]   ;;  %v2758_v9 = vld [vmem:[#allocation11 + $0xe8] sm:$0xff]  }
  0x82   :  { %v2752_v3 = vld [vmem:[#allocation11 + $0xb8] sm:$0xff]   ;;  %2538 = vmatpush3.bf16.msra.mxu0 %v2751_v2  ;;  %v2756_v7 = vld [vmem:[#allocation11 + $0xb0] sm:$0xff]   ;;  %v2759_v10 = vld [vmem:[#allocation11 + $0x28] sm:$0xff]  }
  0x83   :  { %2560 = vmatpush3.bf16.msra.mxu1 %v2752_v3  ;;  %2539 = vmatprep.subr.bf16.mxu0 %v2753_v4  ;;  %v2760_v11 = vld [vmem:[#allocation11 + $0xa8] sm:$0xff]   ;;  %v2761_v12 = vld [vmem:[#allocation11 + $0x60] sm:$0xff]   ;;  %v2765_v16 = vld [vmem:[#allocation11 + $0x58] sm:$0xff]  }
  0x84   :  { %2561 = vmatprep.subr.bf16.mxu1 %v2754_v5  ;;  %v2762_v13 = vld [vmem:[#allocation11 + $0xe0] sm:$0xff]   ;;  %v2766_v17 = vld [vmem:[#allocation11 + $0xd8] sm:$0xff]   ;;  %v2769_v20 = vld [vmem:[#allocation11 + $0x50] sm:$0xff]  }
  0x85   :  { %v2763_v14 = vld [vmem:[#allocation11 + $0x20] sm:$0xff]   ;;  %v2767_v18 = vld [vmem:[#allocation11 + $0x18] sm:$0xff]   ;;  %v2770_v21 = vld [vmem:[#allocation11 + $0xd0] sm:$0xff]  }
  0x86   :  { %2540 = vmatpush3.bf16.msra.mxu0 %v2755_v6  ;;  %v2764_v15 = vld [vmem:[#allocation11 + $0xa0] sm:$0xff]   ;;  %v2768_v19 = vld [vmem:[#allocation11 + $0x98] sm:$0xff]   ;;  %v2771_v22 = vld [vmem:[#allocation11 + $0x10] sm:$0xff]  }
  0x87   :  { %2562 = vmatpush3.bf16.msra.mxu1 %v2756_v7  ;;  %2541 = vmatprep.subr.bf16.mxu0 %v2757_v8  ;;  %v2772_v23 = vld [vmem:[#allocation11 + $0x90] sm:$0xff]   ;;  %v2773_v24 = vld [vmem:[#allocation11 + $0x48] sm:$0xff]   ;;  %v2777_v28 = vld [vmem:[#allocation11 + $0x40] sm:$0xff]  }
  0x88   :  { %2563 = vmatprep.subr.bf16.mxu1 %v2758_v9  ;;  %v2774_v25 = vld [vmem:[#allocation11 + $0xc8] sm:$0xff]   ;;  %v2778_v29 = vld [vmem:[#allocation11 + $0xc0] sm:$0xff]   ;;  %v192_v33 = vld [vmem:[#allocation4 + $0x18] sm:$0xff] }
  0x89   :  { %v2775_v26 = vld [vmem:[#allocation11 + $0x8] sm:$0xff]   ;;  %v2779_v30 = vld [vmem:[#allocation11] sm:$0xff]   ;;  %v196_v36 = vpack.c.bf16 %v192_v33, %v192_v33  ;;  %v191_v38 = vld [vmem:[#allocation4 + $0x10] sm:$0xff] }
  0x8a   :  { %2542 = vmatpush3.bf16.msra.mxu0 %v2759_v10  ;;  %v2776_v27 = vld [vmem:[#allocation11 + $0x88] sm:$0xff]   ;;  %v2780_v31 = vld [vmem:[#allocation11 + $0x80] sm:$0xff]   ;;  %v195_v39 = vpack.c.bf16 %v191_v38, %v191_v38  ;;  %v2781_v40 = vld [vmem:[#allocation12 + $0x78] sm:$0xff]  }
  0x8b   :  { %2564 = vmatpush3.bf16.msra.mxu1 %v2760_v11  ;;  %2543 = vmatprep.subr.bf16.mxu0 %v2761_v12  ;;  %v190_v32 = vld [vmem:[#allocation4 + $0x8] sm:$0xff]  ;;  %v189_v34 = vld [vmem:[#allocation4] sm:$0xff]  ;;  %v2782_v41 = vld [vmem:[#allocation12 + $0xf8] sm:$0xff]  }
  0x8c   :  { %2565 = vmatprep.subr.bf16.mxu1 %v2762_v13  ;;  %v194_v35 = vpack.c.bf16 %v190_v32, %v190_v32  ;;  %v193_v37 = vpack.c.bf16 %v189_v34, %v189_v34  ;;  %532 = vmatprep.mubr.bf16.mxu1 %v196_v36  ;;  %v2783_v42 = vld [vmem:[#allocation12 + $0x38] sm:$0xff]   ;;  %v2785_v44 = vld [vmem:[#allocation12 + $0x70] sm:$0xff]   ;;  %v2789_v48 = vld [vmem:[#allocation12 + $0x68] sm:$0xff]  }
  0x8d   :  { %v2784_v43 = vld [vmem:[#allocation12 + $0xb8] sm:$0xff]   ;;  %v2786_v45 = vld [vmem:[#allocation12 + $0xf0] sm:$0xff]   ;;  %v2790_v49 = vld [vmem:[#allocation12 + $0xe8] sm:$0xff]  }
  0x8e   :  { %2544 = vmatpush3.bf16.msra.mxu0 %v2763_v14  ;;  %492 = vmatprep.mubr.bf16.mxu0 %v194_v35  ;;  %v2787_v46 = vld [vmem:[#allocation12 + $0x30] sm:$0xff]   ;;  %v2791_v50 = vld [vmem:[#allocation12 + $0x28] sm:$0xff]   ;;  %v2793_v52 = vld [vmem:[#allocation12 + $0x60] sm:$0xff]  }
  0x8f   :  { %2566 = vmatpush3.bf16.msra.mxu1 %v2764_v15  ;;  %2545 = vmatprep.subr.bf16.mxu0 %v2765_v16  ;;  %v2788_v47 = vld [vmem:[#allocation12 + $0xb0] sm:$0xff]   ;;  %v2792_v51 = vld [vmem:[#allocation12 + $0xa8] sm:$0xff]   ;;  %v2794_v53 = vld [vmem:[#allocation12 + $0xe0] sm:$0xff]  }
  0x90   :  { %2567 = vmatprep.subr.bf16.mxu1 %v2766_v17  ;;  %v2795_v54 = vld [vmem:[#allocation12 + $0x20] sm:$0xff]   ;;  %v2797_v56 = vld [vmem:[#allocation12 + $0x58] sm:$0xff]   ;;  %v2801_v60 = vld [vmem:[#allocation12 + $0x50] sm:$0xff]  }
  0x91   :  { %v2796_v55 = vld [vmem:[#allocation12 + $0xa0] sm:$0xff]   ;;  %v2798_v57 = vld [vmem:[#allocation12 + $0xd8] sm:$0xff]   ;;  %v2802_v61 = vld [vmem:[#allocation12 + $0xd0] sm:$0xff]  }
  0x92   :  { %2546 = vmatpush3.bf16.msra.mxu0 %v2767_v18  ;;  %v2799_v58 = vld [vmem:[#allocation12 + $0x18] sm:$0xff]   ;;  %v2803_v62 = vld [vmem:[#allocation12 + $0x10] sm:$0xff]   ;;  %v2805_v0 = vld [vmem:[#allocation12 + $0x48] sm:$0xff]  }
  0x93   :  { %2568 = vmatpush3.bf16.msra.mxu1 %v2768_v19  ;;  %2547 = vmatprep.subr.bf16.mxu0 %v2769_v20  ;;  %v2800_v59 = vld [vmem:[#allocation12 + $0x98] sm:$0xff]   ;;  %v2804_v63 = vld [vmem:[#allocation12 + $0x90] sm:$0xff]   ;;  %v2806_v1 = vld [vmem:[#allocation12 + $0xc8] sm:$0xff]  }
  0x94   :  { %2569 = vmatprep.subr.bf16.mxu1 %v2770_v21  ;;  %v2807_v2 = vld [vmem:[#allocation12 + $0x8] sm:$0xff]   ;;  %v2809_v4 = vld [vmem:[#allocation12 + $0x40] sm:$0xff]   ;;  %v544_v9 = vld [vmem:[#allocation6 + $0x18] sm:$0xff] }
  0x95   :  { %v2808_v3 = vld [vmem:[#allocation12 + $0x88] sm:$0xff]   ;;  %v2810_v5 = vld [vmem:[#allocation12 + $0xc0] sm:$0xff]   ;;  %v550_v11 = vpack.c.bf16 %v544_v9, %v544_v9  ;;  %v543_v13 = vld [vmem:[#allocation6 + $0x10] sm:$0xff] }
  0x96   :  { %2548 = vmatpush3.bf16.msra.mxu0 %v2771_v22  ;;  %v2811_v6 = vld [vmem:[#allocation12] sm:$0xff]   ;;  %v542_v8 = vld [vmem:[#allocation6 + $0x8] sm:$0xff]  ;;  %v549_v15 = vpack.c.bf16 %v543_v13, %v543_v13  ;;  %v2813_v16 = vld [vmem:[#allocation12 + $0x178] sm:$0xff]  }
  0x97   :  { %2570 = vmatpush3.bf16.msra.mxu1 %v2772_v23  ;;  %2549 = vmatprep.subr.bf16.mxu0 %v2773_v24  ;;  %v2812_v7 = vld [vmem:[#allocation12 + $0x80] sm:$0xff]   ;;  %v548_v10 = vpack.c.bf16 %v542_v8, %v542_v8  ;;  %v2814_v17 = vld [vmem:[#allocation14 + $0x78] sm:$0xff]   ;;  %v2817_v20 = vld [vmem:[#allocation12 + $0x170] sm:$0xff]  }
  0x98   :  { %2571 = vmatprep.subr.bf16.mxu1 %v2774_v25  ;;  %v541_v12 = vld [vmem:[#allocation6] sm:$0xff]  ;;  %v2815_v18 = vld [vmem:[#allocation12 + $0x138] sm:$0xff]   ;;  %v2818_v21 = vld [vmem:[#allocation14 + $0x70] sm:$0xff]  }
  0x99   :  { %v547_v14 = vpack.c.bf16 %v541_v12, %v541_v12  ;;  %v2816_v19 = vld [vmem:[#allocation14 + $0x38] sm:$0xff]   ;;  %v2819_v22 = vld [vmem:[#allocation12 + $0x130] sm:$0xff]   ;;  %v2821_v24 = vld [vmem:[#allocation12 + $0x168] sm:$0xff]  }
  0x9a   :  { %2550 = vmatpush3.bf16.msra.mxu0 %v2775_v26  ;;  %v2820_v23 = vld [vmem:[#allocation14 + $0x30] sm:$0xff]   ;;  %v2822_v25 = vld [vmem:[#allocation14 + $0x68] sm:$0xff]   ;;  %v2829_v32 = vld [vmem:[#allocation12 + $0x158] sm:$0xff]  }
  0x9b   :  { %2572 = vmatpush3.bf16.msra.mxu1 %v2776_v27  ;;  %2551 = vmatprep.subr.bf16.mxu0 %v2777_v28  ;;  %v2823_v26 = vld [vmem:[#allocation12 + $0x128] sm:$0xff]   ;;  %v2825_v28 = vld [vmem:[#allocation12 + $0x160] sm:$0xff]   ;;  %v2830_v33 = vld [vmem:[#allocation14 + $0x58] sm:$0xff]  }
  0x9c   :  { %2573 = vmatprep.subr.bf16.mxu1 %v2778_v29  ;;  %v2824_v27 = vld [vmem:[#allocation14 + $0x28] sm:$0xff]   ;;  %v2826_v29 = vld [vmem:[#allocation14 + $0x60] sm:$0xff]   ;;  %v2831_v34 = vld [vmem:[#allocation12 + $0x118] sm:$0xff]  }
  0x9d   :  { %v2832_v35 = vld [vmem:[#allocation14 + $0x18] sm:$0xff]   ;;  %v2833_v36 = vld [vmem:[#allocation12 + $0x150] sm:$0xff]  }
  0x9e   :  { %2552 = vmatpush3.bf16.msra.mxu0 %v2779_v30  ;;  %v2827_v30 = vld [vmem:[#allocation12 + $0x120] sm:$0xff]   ;;  %v2835_v38 = vld [vmem:[#allocation12 + $0x110] sm:$0xff]   ;;  %v2861_v8 = vld [vmem:[#allocation14 + $0xd8] sm:$0xff]  }
  0x9f   :  { %2574 = vmatpush3.bf16.msra.mxu1 %v2780_v31  ;;  %2581 = vmatprep.subr.bf16.mxu0 %v2781_v40  ;;  %v2828_v31 = vld [vmem:[#allocation14 + $0x20] sm:$0xff]   ;;  %v2837_v40 = vld [vmem:[#allocation12 + $0x148] sm:$0xff]   ;;  %v2862_v9 = vld [vmem:[#allocation15 + $0x58] sm:$0xff]  }
  0xa0   :  { %2603 = vmatprep.subr.bf16.mxu1 %v2782_v41  ;;  %v2838_v41 = vld [vmem:[#allocation14 + $0x48] sm:$0xff]   ;;  %v2865_v12 = vld [vmem:[#allocation14 + $0xd0] sm:$0xff]  }
  0xa1   :  { %493 = vmatmul.mubr.bf16.vlgmr.msra.gmra.mxu0 %v193_v37  ;;  %v2834_v37 = vld [vmem:[#allocation14 + $0x50] sm:$0xff]  }
  0xa2   :  { %533 = vmatmul.mubr.bf16.vlgmr.msra.gmra.mxu1 %v195_v39  ;;  %2582 = vmatpush3.bf16.msra.mxu0 %v2783_v42  ;;  %v2836_v39 = vld [vmem:[#allocation14 + $0x10] sm:$0xff]   ;;  %v2839_v42 = vld [vmem:[#allocation12 + $0x108] sm:$0xff]  }
  0xa3   :  { %2604 = vmatpush3.bf16.msra.mxu1 %v2784_v43  ;;  %2583 = vmatprep.subr.bf16.mxu0 %v2785_v44  ;;  %v2840_v43 = vld [vmem:[#allocation14 + $0x8] sm:$0xff]   ;;  %v2841_v44 = vld [vmem:[#allocation12 + $0x140] sm:$0xff]   ;;  %v2866_v13 = vld [vmem:[#allocation15 + $0x50] sm:$0xff]  }
  0xa4   :  { %2605 = vmatprep.subr.bf16.mxu1 %v2786_v45  ;;  %976 = vmatprep.mubr.bf16.mxu0 %v548_v10  ;;  %v2842_v45 = vld [vmem:[#allocation14 + $0x40] sm:$0xff]   ;;  %v2863_v10 = vld [vmem:[#allocation14 + $0x98] sm:$0xff]  }
  0xa5   :  { %1016 = vmatprep.mubr.bf16.mxu1 %v550_v11  ;;  %v2864_v11 = vld [vmem:[#allocation15 + $0x18] sm:$0xff]  }
  0xa6   :  { %2584 = vmatpush3.bf16.msra.mxu0 %v2787_v46  ;;  %v2843_v46 = vld [vmem:[#allocation12 + $0x100] sm:$0xff]  }
  0xa7   :  { %2606 = vmatpush3.bf16.msra.mxu1 %v2788_v47  ;;  %2585 = vmatprep.subr.bf16.mxu0 %v2789_v48  ;;  %v2844_v47 = vld [vmem:[#allocation14] sm:$0xff]   ;;  %v546_v48 = vld [vmem:[#allocation6 + $0x28] sm:$0xff] }
  0xa8   :  { %2607 = vmatprep.subr.bf16.mxu1 %v2790_v49  ;;  %v552_v49 = vpack.c.bf16 %v546_v48, %v546_v48  ;;  %v2892_v48 = vld [vmem:[#allocation17 + $0x20] ss:$8 sps:$4 sm:$0xff]  }
  0xaa   :  { %2586 = vmatpush3.bf16.msra.mxu0 %v2791_v50  ;;  %v1066_v50 = vld [vmem:[#allocation8 + $0x8] sm:$0xff] }
  0xab   :  { %2608 = vmatpush3.bf16.msra.mxu1 %v2792_v51  ;;  %2587 = vmatprep.subr.bf16.mxu0 %v2793_v52  ;;  %v545_v51 = vld [vmem:[#allocation6 + $0x20] sm:$0xff]  ;;  %v1065_v52 = vld [vmem:[#allocation8] sm:$0xff] }
  0xac   :  { %2609 = vmatprep.subr.bf16.mxu1 %v2794_v53  ;;  %v1070_v53 = vpack.c.bf16 %v1066_v50, %v1066_v50  ;;  %v2916_v50 = vld [vmem:[#allocation17 + $0x150] ss:$8 sps:$4 sm:$0xff]  }
  0xae   :  { %2588 = vmatpush3.bf16.msra.mxu0 %v2795_v54  ;;  %v551_v54 = vpack.c.bf16 %v545_v51, %v545_v51  ;;  %v2924_v51 = vld [vmem:[#allocation17 + $0x144] ss:$8 sps:$4 sm:$0xff]  }
  0xaf   :  { %2610 = vmatpush3.bf16.msra.mxu1 %v2796_v55  ;;  %2589 = vmatprep.subr.bf16.mxu0 %v2797_v56  ;;  %v1069_v55 = vpack.c.bf16 %v1065_v52, %v1065_v52  ;;  %v2845_v56 = vld [vmem:[#allocation14 + $0xf8] sm:$0xff]  }
  0xb0   :  { %2611 = vmatprep.subr.bf16.mxu1 %v2798_v57  ;;  %v2846_v57 = vld [vmem:[#allocation15 + $0x78] sm:$0xff]  }
  0xb1   :  { %v2895_v52 = vld [vmem:[#allocation17 + $0x10] ss:$8 sps:$4 sm:$0xff]  }
  0xb2   :  { %2590 = vmatpush3.bf16.msra.mxu0 %v2799_v58  ;;  %v2847_v58 = vld [vmem:[#allocation14 + $0xb8] sm:$0xff]  }
  0xb3   :  { %2612 = vmatpush3.bf16.msra.mxu1 %v2800_v59  ;;  %2591 = vmatprep.subr.bf16.mxu0 %v2801_v60  ;;  %v2848_v59 = vld [vmem:[#allocation15 + $0x38] sm:$0xff]   ;;  %v2849_v60 = vld [vmem:[#allocation14 + $0xf0] sm:$0xff]  }
  0xb4   :  { %2613 = vmatprep.subr.bf16.mxu1 %v2802_v61  ;;  %v2850_v61 = vld [vmem:[#allocation15 + $0x70] sm:$0xff]  }
  0xb6   :  { %2592 = vmatpush3.bf16.msra.mxu0 %v2803_v62  ;;  %v2851_v62 = vld [vmem:[#allocation14 + $0xb0] sm:$0xff]  }
  0xb7   :  { %2614 = vmatpush3.bf16.msra.mxu1 %v2804_v63  ;;  %2593 = vmatprep.subr.bf16.mxu0 %v2805_v0  ;;  %v2852_v63 = vld [vmem:[#allocation15 + $0x30] sm:$0xff]   ;;  %v2853_v0 = vld [vmem:[#allocation14 + $0xe8] sm:$0xff]  }
  0xb8   :  { %2615 = vmatprep.subr.bf16.mxu1 %v2806_v1  ;;  %v2854_v1 = vld [vmem:[#allocation15 + $0x68] sm:$0xff]  }
  0xba   :  { %2594 = vmatpush3.bf16.msra.mxu0 %v2807_v2  ;;  %v2855_v2 = vld [vmem:[#allocation14 + $0xa8] sm:$0xff]  }
  0xbb   :  { %2616 = vmatpush3.bf16.msra.mxu1 %v2808_v3  ;;  %2595 = vmatprep.subr.bf16.mxu0 %v2809_v4  ;;  %v2856_v3 = vld [vmem:[#allocation15 + $0x28] sm:$0xff]   ;;  %v2857_v4 = vld [vmem:[#allocation14 + $0xe0] sm:$0xff]  }
  0xbc   :  { %2617 = vmatprep.subr.bf16.mxu1 %v2810_v5  ;;  %v2858_v5 = vld [vmem:[#allocation15 + $0x60] sm:$0xff]  }
  0xbe   :  { %2596 = vmatpush3.bf16.msra.mxu0 %v2811_v6  ;;  %v2859_v6 = vld [vmem:[#allocation14 + $0xa0] sm:$0xff]  }
  0xbf   :  { %2618 = vmatpush3.bf16.msra.mxu1 %v2812_v7  ;;  %2625 = vmatprep.subr.bf16.mxu0 %v2813_v16  ;;  %v2860_v7 = vld [vmem:[#allocation15 + $0x20] sm:$0xff]   ;;  %v2869_v16 = vld [vmem:[#allocation14 + $0xc8] sm:$0xff]  }
  0xc0   :  { %2647 = vmatprep.subr.bf16.mxu1 %v2814_v17  ;;  %v2870_v17 = vld [vmem:[#allocation15 + $0x48] sm:$0xff]  }
  0xc1   :  { %977 = vmatmul.mubr.bf16.vlgmr.msra.gmra.mxu0 %v547_v14  ;;  %v2867_v14 = vld [vmem:[#allocation14 + $0x90] sm:$0xff]  }
  0xc2   :  { %1017 = vmatmul.mubr.bf16.vlgmr.msra.gmra.mxu1 %v549_v15  ;;  %2626 = vmatpush3.bf16.msra.mxu0 %v2815_v18  ;;  %v2868_v15 = vld [vmem:[#allocation15 + $0x10] sm:$0xff]   ;;  %v2871_v18 = vld [vmem:[#allocation14 + $0x88] sm:$0xff]  }
  0xc3   :  { %2648 = vmatpush3.bf16.msra.mxu1 %v2816_v19  ;;  %2627 = vmatprep.subr.bf16.mxu0 %v2817_v20  ;;  %v2872_v19 = vld [vmem:[#allocation15 + $0x8] sm:$0xff]   ;;  %v2873_v20 = vld [vmem:[#allocation14 + $0xc0] sm:$0xff]  }
  0xc4   :  { %2649 = vmatprep.subr.bf16.mxu1 %v2818_v21  ;;  %1056 = vmatprep.mubr.bf16.mxu0 %v552_v49  ;;  %v2874_v21 = vld [vmem:[#allocation15 + $0x40] sm:$0xff]   ;;  %v2897_v49 = vld [vmem:[#allocation17 + $0x14] ss:$8 sps:$4 sm:$0xff]  }
  0xc5   :  { %1368 = vmatprep.mubr.bf16.mxu1 %v1070_v53  ;;  %v2900_v53 = vld [vmem:[#allocation17 + $0x4] ss:$8 sps:$4 sm:$0xff]  }
  0xc6   :  { %2628 = vmatpush3.bf16.msra.mxu0 %v2819_v22  ;;  %v2875_v22 = vld [vmem:[#allocation14 + $0x80] sm:$0xff]  }
  0xc7   :  { %2650 = vmatpush3.bf16.msra.mxu1 %v2820_v23  ;;  %2629 = vmatprep.subr.bf16.mxu0 %v2821_v24  ;;  %v2876_v23 = vld [vmem:[#allocation15] sm:$0xff]   ;;  %v1068_v24 = vld [vmem:[#allocation8 + $0x18] sm:$0xff] }
  0xc8   :  { %2651 = vmatprep.subr.bf16.mxu1 %v2822_v25  ;;  %v1418_v25 = vld [vmem:[#allocation9 + $0x8] sm:$0xff] }
  0xca   :  { %2630 = vmatpush3.bf16.msra.mxu0 %v2823_v26  ;;  %v1067_v26 = vld [vmem:[#allocation8 + $0x10] sm:$0xff] }
  0xcb   :  { %2652 = vmatpush3.bf16.msra.mxu1 %v2824_v27  ;;  %2631 = vmatprep.subr.bf16.mxu0 %v2825_v28  ;;  %v1072_v27 = vpack.c.bf16 %v1068_v24, %v1068_v24  ;;  %v1420_v28 = vpack.c.bf16 %v1418_v25, %v1418_v25  ;;  %v2943_v24 = vld [vmem:[#allocation17 + $0x80] ss:$8 sps:$4 sm:$0xff]   ;;  %v2961_v25 = vld [vmem:[#allocation17 + $0x1b0] ss:$8 sps:$4 sm:$0xff]  }
  0xcc   :  { %2653 = vmatprep.subr.bf16.mxu1 %v2826_v29  ;;  %v1071_v29 = vpack.c.bf16 %v1067_v26, %v1067_v26  ;;  %v2966_v26 = vld [vmem:[#allocation17 + $0x1a4] ss:$8 sps:$4 sm:$0xff]  }
  0xce   :  { %2632 = vmatpush3.bf16.msra.mxu0 %v2827_v30  ;;  %v1417_v30 = vld [vmem:[#allocation9] sm:$0xff] }
  0xcf   :  { %2654 = vmatpush3.bf16.msra.mxu1 %v2828_v31  ;;  %2633 = vmatprep.subr.bf16.mxu0 %v2829_v32  ;;  %v1419_v31 = vpack.c.bf16 %v1417_v30, %v1417_v30  ;;  %v2877_v32 = vld [vmem:[#allocation17 + $0x70] ss:$8 sps:$4 sm:$0xff]   ;;  %v2972_v30 = vld [vmem:[#allocation17 + $0x184] ss:$8 sps:$4 sm:$0xff]  }
  0xd0   :  { %2655 = vmatprep.subr.bf16.mxu1 %v2830_v33  ;;  %v2879_v33 = vld [vmem:[#allocation17 + $0x74] ss:$8 sps:$4 sm:$0xff]  }
  0xd2   :  { %2634 = vmatpush3.bf16.msra.mxu0 %v2831_v34  ;;  %v2882_v34 = vld [vmem:[#allocation17 + $0x64] ss:$8 sps:$4 sm:$0xff]  }
  0xd3   :  { %2656 = vmatpush3.bf16.msra.mxu1 %v2832_v35  ;;  %2635 = vmatprep.subr.bf16.mxu0 %v2833_v36  ;;  %v2880_v35 = vld [vmem:[#allocation17 + $0x60] ss:$8 sps:$4 sm:$0xff]   ;;  %v2885_v36 = vld [vmem:[#allocation17 + $0x54] ss:$8 sps:$4 sm:$0xff]  }
  0xd4   :  { %2657 = vmatprep.subr.bf16.mxu1 %v2834_v37  ;;  %v2883_v37 = vld [vmem:[#allocation17 + $0x50] ss:$8 sps:$4 sm:$0xff]  }
  0xd6   :  { %2636 = vmatpush3.bf16.msra.mxu0 %v2835_v38  ;;  %v2888_v38 = vld [vmem:[#allocation17 + $0x44] ss:$8 sps:$4 sm:$0xff]  }
  0xd7   :  { %2658 = vmatpush3.bf16.msra.mxu1 %v2836_v39  ;;  %2637 = vmatprep.subr.bf16.mxu0 %v2837_v40  ;;  %v2886_v39 = vld [vmem:[#allocation17 + $0x40] ss:$8 sps:$4 sm:$0xff]   ;;  %v2891_v40 = vld [vmem:[#allocation17 + $0x34] ss:$8 sps:$4 sm:$0xff]  }
  0xd8   :  { %2659 = vmatprep.subr.bf16.mxu1 %v2838_v41  ;;  %v2904_v41 = vld [vmem:[#allocation17 + $0x170] ss:$8 sps:$4 sm:$0xff]  }
  0xda   :  { %2638 = vmatpush3.bf16.msra.mxu0 %v2839_v42  ;;  %v2906_v42 = vld [vmem:[#allocation17 + $0x174] ss:$8 sps:$4 sm:$0xff]  }
  0xdb   :  { %2660 = vmatpush3.bf16.msra.mxu1 %v2840_v43  ;;  %2639 = vmatprep.subr.bf16.mxu0 %v2841_v44  ;;  %v2889_v43 = vld [vmem:[#allocation17 + $0x30] ss:$8 sps:$4 sm:$0xff]   ;;  %v2912_v44 = vld [vmem:[#allocation17 + $0x164] ss:$8 sps:$4 sm:$0xff]  }
  0xdc   :  { %2661 = vmatprep.subr.bf16.mxu1 %v2842_v45  ;;  %v2910_v45 = vld [vmem:[#allocation17 + $0x160] ss:$8 sps:$4 sm:$0xff]  }
  0xde   :  { %2640 = vmatpush3.bf16.msra.mxu0 %v2843_v46  ;;  %v2894_v46 = vld [vmem:[#allocation17 + $0x24] ss:$8 sps:$4 sm:$0xff]  }
  0xdf   :  { %2662 = vmatpush3.bf16.msra.mxu1 %v2844_v47  ;;  %2669 = vmatprep.subr.bf16.mxu0 %v2845_v56  ;;  %v2918_v47 = vld [vmem:[#allocation17 + $0x154] ss:$8 sps:$4 sm:$0xff]   ;;  %v2898_v56 = vld [vmem:[#allocation17] ss:$8 sps:$4 sm:$0xff]  }
  0xe0   :  { %2691 = vmatprep.subr.bf16.mxu1 %v2846_v57  ;;  %v2928_v57 = vld [vmem:[#allocation17 + $0x130] ss:$8 sps:$4 sm:$0xff]  }
  0xe1   :  { %1057 = vmatmul.mubr.bf16.vlgmr.msra.gmra.mxu0 %v551_v54  ;;  %v2922_v54 = vld [vmem:[#allocation17 + $0x140] ss:$8 sps:$4 sm:$0xff]  }
  0xe2   :  { %1369 = vmatmul.mubr.bf16.vlgmr.msra.gmra.mxu1 %v1069_v55  ;;  %2670 = vmatpush3.bf16.msra.mxu0 %v2847_v58  ;;  %v2930_v55 = vld [vmem:[#allocation17 + $0x134] ss:$8 sps:$4 sm:$0xff]  }
  0xe3   :  { %2692 = vmatpush3.bf16.msra.mxu1 %v2848_v59  ;;  %2671 = vmatprep.subr.bf16.mxu0 %v2849_v60  ;;  %v2903_v58 = vld [vmem:[#allocation17 + $0xf4] ss:$8 sps:$4 sm:$0xff]   ;;  %v2901_v59 = vld [vmem:[#allocation17 + $0xf0] ss:$8 sps:$4 sm:$0xff]   ;;  %v2936_v60 = vld [vmem:[#allocation17 + $0x124] ss:$8 sps:$4 sm:$0xff]  }
  0xe4   :  { %2693 = vmatprep.subr.bf16.mxu1 %v2850_v61  ;;  %1408 = vmatprep.mubr.bf16.mxu0 %v1072_v27  ;;  %v2909_v61 = vld [vmem:[#allocation17 + $0xe4] ss:$8 sps:$4 sm:$0xff]   ;;  %v2964_v27 = vld [vmem:[#allocation17 + $0x1a0] ss:$8 sps:$4 sm:$0xff]  }
  0xe5   :  { %1588 = vmatprep.mubr.bf16.mxu1 %v1420_v28  ;;  %v2969_v28 = vld [vmem:[#allocation17 + $0x194] ss:$8 sps:$4 sm:$0xff]  }
  0xe6   :  { %2672 = vmatpush3.bf16.msra.mxu0 %v2851_v62  ;;  %v2934_v62 = vld [vmem:[#allocation17 + $0x120] ss:$8 sps:$4 sm:$0xff]  }
  0xe7   :  { %2694 = vmatpush3.bf16.msra.mxu1 %v2852_v63  ;;  %2673 = vmatprep.subr.bf16.mxu0 %v2853_v0  ;;  %v2907_v63 = vld [vmem:[#allocation17 + $0xe0] ss:$8 sps:$4 sm:$0xff]   ;;  %v2942_v0 = vld [vmem:[#allocation17 + $0x114] ss:$8 sps:$4 sm:$0xff]  }
  0xe8   :  { %2695 = vmatprep.subr.bf16.mxu1 %v2854_v1  ;;  %v2915_v1 = vld [vmem:[#allocation17 + $0xd4] ss:$8 sps:$4 sm:$0xff]  }
  0xea   :  { %2674 = vmatpush3.bf16.msra.mxu0 %v2855_v2  ;;  %v2940_v2 = vld [vmem:[#allocation17 + $0x110] ss:$8 sps:$4 sm:$0xff]  }
  0xeb   :  { %2696 = vmatpush3.bf16.msra.mxu1 %v2856_v3  ;;  %2675 = vmatprep.subr.bf16.mxu0 %v2857_v4  ;;  %v2913_v3 = vld [vmem:[#allocation17 + $0xd0] ss:$8 sps:$4 sm:$0xff]   ;;  %v2948_v4 = vld [vmem:[#allocation17 + $0x104] ss:$8 sps:$4 sm:$0xff]  }
  0xec   :  { %2697 = vmatprep.subr.bf16.mxu1 %v2858_v5  ;;  %v2921_v5 = vld [vmem:[#allocation17 + $0xc4] ss:$8 sps:$4 sm:$0xff]  }
  0xee   :  { %2676 = vmatpush3.bf16.msra.mxu0 %v2859_v6  ;;  %v2946_v6 = vld [vmem:[#allocation17 + $0x100] ss:$8 sps:$4 sm:$0xff]  }
  0xef   :  { %2698 = vmatpush3.bf16.msra.mxu1 %v2860_v7  ;;  %2677 = vmatprep.subr.bf16.mxu0 %v2861_v8  ;;  %v2919_v7 = vld [vmem:[#allocation17 + $0xc0] ss:$8 sps:$4 sm:$0xff]   ;;  %v2949_v8 = vld [vmem:[#allocation17 + $0x1f0] ss:$8 sps:$4 sm:$0xff]  }
  0xf0   :  { %2699 = vmatprep.subr.bf16.mxu1 %v2862_v9  ;;  %v2951_v9 = vld [vmem:[#allocation17 + $0x1f4] ss:$8 sps:$4 sm:$0xff]  }
  0xf2   :  { %2678 = vmatpush3.bf16.msra.mxu0 %v2863_v10  ;;  %v2927_v10 = vld [vmem:[#allocation17 + $0xb4] ss:$8 sps:$4 sm:$0xff]  }
  0xf3   :  { %2700 = vmatpush3.bf16.msra.mxu1 %v2864_v11  ;;  %2679 = vmatprep.subr.bf16.mxu0 %v2865_v12  ;;  %v2954_v11 = vld [vmem:[#allocation17 + $0x1e4] ss:$8 sps:$4 sm:$0xff]   ;;  %v2925_v12 = vld [vmem:[#allocation17 + $0xb0] ss:$8 sps:$4 sm:$0xff]  }
  0xf4   :  { %2701 = vmatprep.subr.bf16.mxu1 %v2866_v13  ;;  %v2952_v13 = vld [vmem:[#allocation17 + $0x1e0] ss:$8 sps:$4 sm:$0xff]  }
  0xf6   :  { %2680 = vmatpush3.bf16.msra.mxu0 %v2867_v14  ;;  %v2933_v14 = vld [vmem:[#allocation17 + $0xa4] ss:$8 sps:$4 sm:$0xff]  }
  0xf7   :  { %2702 = vmatpush3.bf16.msra.mxu1 %v2868_v15  ;;  %2681 = vmatprep.subr.bf16.mxu0 %v2869_v16  ;;  %v2957_v15 = vld [vmem:[#allocation17 + $0x1d4] ss:$8 sps:$4 sm:$0xff]   ;;  %v2931_v16 = vld [vmem:[#allocation17 + $0xa0] ss:$8 sps:$4 sm:$0xff]  }
  0xf8   :  { %2703 = vmatprep.subr.bf16.mxu1 %v2870_v17  ;;  %v2955_v17 = vld [vmem:[#allocation17 + $0x1d0] ss:$8 sps:$4 sm:$0xff]  }
  0xfa   :  { %2682 = vmatpush3.bf16.msra.mxu0 %v2871_v18  ;;  %v2939_v18 = vld [vmem:[#allocation17 + $0x94] ss:$8 sps:$4 sm:$0xff]  }
  0xfb   :  { %2704 = vmatpush3.bf16.msra.mxu1 %v2872_v19  ;;  %2683 = vmatprep.subr.bf16.mxu0 %v2873_v20  ;;  %v2960_v19 = vld [vmem:[#allocation17 + $0x1c4] ss:$8 sps:$4 sm:$0xff]   ;;  %v2937_v20 = vld [vmem:[#allocation17 + $0x90] ss:$8 sps:$4 sm:$0xff]  }
  0xfc   :  { %2705 = vmatprep.subr.bf16.mxu1 %v2874_v21  ;;  %v2958_v21 = vld [vmem:[#allocation17 + $0x1c0] ss:$8 sps:$4 sm:$0xff]  }
  0xfe   :  { %2684 = vmatpush3.bf16.msra.mxu0 %v2875_v22  ;;  %v2945_v22 = vld [vmem:[#allocation17 + $0x84] ss:$8 sps:$4 sm:$0xff]  }
  0xff   :  { %2706 = vmatpush3.bf16.msra.mxu1 %v2876_v23  ;;  %2017 = vmatprep.subr.bf16.mxu0 %v2879_v33  ;;  %v2963_v23 = vld [vmem:[#allocation17 + $0x1b4] ss:$8 sps:$4 sm:$0xff]  }
 0x100   :  { %2058 = vmatprep.subr.bf16.mxu1 %v2906_v42 }
 0x101   :  { %1409 = vmatmul.mubr.bf16.vlgmr.msra.gmra.mxu0 %v1071_v29  ;;  %v2967_v29 = vld [vmem:[#allocation17 + $0x190] ss:$8 sps:$4 sm:$0xff]  }
 0x102   :  { %1589 = vmatmul.mubr.bf16.vlgmr.msra.gmra.mxu1 %v1419_v31  ;;  %2018 = vmatpush1.bf16.msra.mxu0 %v2877_v32  ;;  %v2970_v31 = vld [vmem:[#allocation17 + $0x180] ss:$8 sps:$4 sm:$0xff]  }
 0x103   :  { %2019 = vmatprep.subr.bf16.mxu0 %v2882_v34  ;;  %2059 = vmatpush1.bf16.msra.mxu1 %v2904_v41  ;;  %v2304_v34 = vld [vmem:[%s3387_s5] ss:$0 sm:$0xff] }
 0x104   :  { %2060 = vmatprep.subr.bf16.mxu1 %v2912_v44 }
 0x106   :  { %2020 = vmatpush1.bf16.msra.mxu0 %v2880_v35 }
 0x107   :  { %2021 = vmatprep.subr.bf16.mxu0 %v2885_v36  ;;  %2061 = vmatpush1.bf16.msra.mxu1 %v2910_v45 }
 0x108   :  { %2062 = vmatprep.subr.bf16.mxu1 %v2918_v47 }
 0x10a   :  { %2022 = vmatpush1.bf16.msra.mxu0 %v2883_v37 }
 0x10b   :  { %2023 = vmatprep.subr.bf16.mxu0 %v2888_v38  ;;  %2063 = vmatpush1.bf16.msra.mxu1 %v2916_v50 }
 0x10c   :  { %2064 = vmatprep.subr.bf16.mxu1 %v2924_v51 }
 0x10e   :  { %2024 = vmatpush1.bf16.msra.mxu0 %v2886_v39 }
 0x10f   :  { %2025 = vmatprep.subr.bf16.mxu0 %v2891_v40  ;;  %2065 = vmatpush1.bf16.msra.mxu1 %v2922_v54  ;;  %v2337_v54 = vld [vmem:[%s3389_s7] ss:$0 sm:$0xff] }
 0x110   :  { %2066 = vmatprep.subr.bf16.mxu1 %v2930_v55 }
 0x112   :  { %2026 = vmatpush1.bf16.msra.mxu0 %v2889_v43 }
 0x113   :  { %2027 = vmatprep.subr.bf16.mxu0 %v2894_v46  ;;  %2067 = vmatpush1.bf16.msra.mxu1 %v2928_v57 }
 0x114   :  { %2068 = vmatprep.subr.bf16.mxu1 %v2936_v60 }
 0x116   :  { %2028 = vmatpush1.bf16.msra.mxu0 %v2892_v48 }
 0x117   :  { %2029 = vmatprep.subr.bf16.mxu0 %v2897_v49  ;;  %2069 = vmatpush1.bf16.msra.mxu1 %v2934_v62 }
 0x118   :  { %2070 = vmatprep.subr.bf16.mxu1 %v2942_v0 }
 0x11a   :  { %2030 = vmatpush1.bf16.msra.mxu0 %v2895_v52 }
 0x11b   :  { %2031 = vmatprep.subr.bf16.mxu0 %v2900_v53  ;;  %2071 = vmatpush1.bf16.msra.mxu1 %v2940_v2 }
 0x11c   :  { %2072 = vmatprep.subr.bf16.mxu1 %v2948_v4 }
 0x11e   :  { %2032 = vmatpush1.bf16.msra.mxu0 %v2898_v56 }
 0x11f   :  { %2033 = vmatprep.subr.bf16.mxu0 %v2903_v58  ;;  %2073 = vmatpush1.bf16.msra.mxu1 %v2946_v6 }
 0x120   :  { %2074 = vmatprep.subr.bf16.mxu1 %v2951_v9  ;;  %v2386_v9 = vld [vmem:[%s3391_s9] ss:$0 sm:$0xff] }
 0x122   :  { %2034 = vmatpush2.bf16.msra.mxu0 %v2901_v59 }
 0x123   :  { %2035 = vmatprep.subr.bf16.mxu0 %v2909_v61  ;;  %2075 = vmatpush2.bf16.msra.mxu1 %v2949_v8 }
 0x124   :  { %2076 = vmatprep.subr.bf16.mxu1 %v2954_v11 }
 0x126   :  { %2036 = vmatpush2.bf16.msra.mxu0 %v2907_v63 }
 0x127   :  { %2037 = vmatprep.subr.bf16.mxu0 %v2915_v1  ;;  %2077 = vmatpush2.bf16.msra.mxu1 %v2952_v13  ;;  %v2419_v13 = vld [vmem:[%s3393_s11] ss:$0 sm:$0xff] }
 0x128   :  { %2078 = vmatprep.subr.bf16.mxu1 %v2957_v15 }
 0x12a   :  { %2038 = vmatpush2.bf16.msra.mxu0 %v2913_v3 }
 0x12b   :  { %2039 = vmatprep.subr.bf16.mxu0 %v2921_v5  ;;  %2079 = vmatpush2.bf16.msra.mxu1 %v2955_v17 }
 0x12c   :  { %2080 = vmatprep.subr.bf16.mxu1 %v2960_v19 }
 0x12e   :  { %2040 = vmatpush2.bf16.msra.mxu0 %v2919_v7 }
 0x12f   :  { %2041 = vmatprep.subr.bf16.mxu0 %v2927_v10  ;;  %2081 = vmatpush2.bf16.msra.mxu1 %v2958_v21 }
 0x130   :  { %2082 = vmatprep.subr.bf16.mxu1 %v2963_v23 }
 0x132   :  { %2042 = vmatpush2.bf16.msra.mxu0 %v2925_v12 }
 0x133   :  { %2043 = vmatprep.subr.bf16.mxu0 %v2933_v14  ;;  %2083 = vmatpush2.bf16.msra.mxu1 %v2961_v25 }
 0x134   :  { %2084 = vmatprep.subr.bf16.mxu1 %v2966_v26 }
 0x136   :  { %2044 = vmatpush2.bf16.msra.mxu0 %v2931_v16 }
 0x137   :  { %2045 = vmatprep.subr.bf16.mxu0 %v2939_v18  ;;  %2085 = vmatpush2.bf16.msra.mxu1 %v2964_v27 }
 0x138   :  { %2086 = vmatprep.subr.bf16.mxu1 %v2969_v28  ;;  %v2973_v28 = vld [vmem:[#allocation18 + $0x78] sm:$0xff]  }
 0x13a   :  { %2046 = vmatpush2.bf16.msra.mxu0 %v2937_v20 }
 0x13b   :  { %2047 = vmatprep.subr.bf16.mxu0 %v2945_v22  ;;  %2087 = vmatpush2.bf16.msra.mxu1 %v2967_v29  ;;  %v2974_v29 = vld [vmem:[#allocation18 + $0x38] sm:$0xff]  }
 0x13c   :  { %2088 = vmatprep.subr.bf16.mxu1 %v2972_v30  ;;  %v2975_v30 = vld [vmem:[#allocation18 + $0x70] sm:$0xff]  }
 0x13e   :  { %2048 = vmatpush2.bf16.msra.mxu0 %v2943_v24 }
 0x13f   :  { %2089 = vmatpush2.bf16.msra.mxu1 %v2970_v31  ;;  %2713 = vmatprep.subr.bf16.mxu0 %v2973_v28  ;;  %v2976_v31 = vld [vmem:[#allocation18 + $0x30] sm:$0xff]  }
 0x161   :  { %v2553_v32 = vpop.f32.mrf.mxu0 }
 0x162   :  { %v2575_v33 = vpop.f32.mrf.mxu1 }
 0x163   :  { %v2554_v35 = vpop.f32.mrf.mxu0 }
 0x164   :  { %v2576_v36 = vpop.f32.mrf.mxu1  ;;  %v2555_v37 = vadd.f32 %v2554_v35, %v2553_v32  ;;  %v2977_v32 = vld [vmem:[#allocation18 + $0x68] sm:$0xff]   ;;  %v2980_v35 = vld [vmem:[#allocation18 + $0x20] sm:$0xff]  }
 0x165   :  { %v2577_v38 = vadd.f32 %v2576_v36, %v2575_v33  ;;  %v2556_v39 = vpop.f32.mrf.mxu0  ;;  %v2978_v33 = vld [vmem:[#allocation18 + $0x28] sm:$0xff]   ;;  %v2981_v36 = vld [vmem:[#allocation18 + $0x58] sm:$0xff]  }
 0x166   :  { %v2578_v40 = vpop.f32.mrf.mxu1  ;;  %v495_v41 = vadd.f32 %v2555_v37, %v2304_v34  ;;  %v2979_v34 = vld [vmem:[#allocation18 + $0x60] sm:$0xff]   ;;  %v2982_v37 = vld [vmem:[#allocation18 + $0x18] sm:$0xff]   ;;  %v2984_v39 = vld [vmem:[#allocation18 + $0x10] sm:$0xff]  }
 0x167   :  { %v2557_v42 = vpop.f32.mrf.mxu0  ;;  %v2985_v40 = vld [vmem:[#allocation18 + $0x48] sm:$0xff]  }
 0x168   :  { %v2579_v43 = vpop.f32.mrf.mxu1  ;;  %v535_v44 = vadd.f32 %v2577_v38, %v495_v41  ;;  %v2983_v38 = vld [vmem:[#allocation18 + $0x50] sm:$0xff]   ;;  %v2986_v41 = vld [vmem:[#allocation18 + $0x8] sm:$0xff]   ;;  %v2987_v42 = vld [vmem:[#allocation18 + $0x40] sm:$0xff]  }
 0x169   :  { %v2988_v43 = vld [vmem:[#allocation18] sm:$0xff]  }
 0x16a   :  { %v540_v2 = vmax.f32 %v535_v44, 0.0 }
 0x16c   :  { %v2533_v7 = vpack.c.bf16 %v540_v2, %v540_v2 }
 0x181   :  { %v2597_v45 = vpop.f32.mrf.mxu0 }
 0x182   :  { %v2619_v46 = vpop.f32.mrf.mxu1 }
 0x183   :  { %v2598_v47 = vpop.f32.mrf.mxu0 }
 0x184   :  { %v2620_v48 = vpop.f32.mrf.mxu1  ;;  %v2599_v53 = vadd.f32 %v2598_v47, %v2597_v45 }
 0x185   :  { %v2600_v49 = vpop.f32.mrf.mxu0  ;;  %v2621_v57 = vadd.f32 %v2620_v48, %v2619_v46  ;;  %v1673_v48 = vlaneseq }
 0x186   :  { %v2622_v50 = vpop.f32.mrf.mxu1  ;;  %v979_v55 = vadd.f32 %v2599_v53, %v2337_v54 }
 0x187   :  { %v2601_v51 = vpop.f32.mrf.mxu0  ;;  %v1674_v49 = vshrl.u32 %v1673_v48, 7 }
 0x188   :  { %v2623_v52 = vpop.f32.mrf.mxu1  ;;  %v1019_v60 = vadd.f32 %v2621_v57, %v979_v55  ;;  %v1671_v51 = vld [vmem:[%s3395_s13] sm:$0x3] }
 0x189   :  { %v1675_v50 = vsub.s32 0, %v1674_v49  ;;  %v1679_v52 = vsub.s32 1, %v1674_v49 }
 0x18b   :  { %v1676_v53 = vrot.slane %v1671_v51, %v1675_v50  ;;  %v1680_v54 = vrot.slane %v1671_v51, %v1679_v52 }
 0x1a1   :  { %v2641_v56 = vpop.f32.mrf.mxu0 }
 0x1a2   :  { %v2663_v58 = vpop.f32.mrf.mxu1 }
 0x1a3   :  { %v2642_v59 = vpop.f32.mrf.mxu0 }
 0x1a4   :  { %v2643_v61 = vadd.f32 %v2642_v59, %v2641_v56  ;;  %v2664_v62 = vpop.f32.mrf.mxu1 }
 0x1a5   :  { %v2644_v63 = vpop.f32.mrf.mxu0  ;;  %v2665_v8 = vadd.f32 %v2664_v62, %v2663_v58 }
 0x1a6   :  { %v1059_v0 = vadd.f32 %v2643_v61, %v1019_v60  ;;  %v2666_v1 = vpop.f32.mrf.mxu1 }
 0x1a7   :  { %v2645_v3 = vpop.f32.mrf.mxu0  ;;  %v1371_v15 = vadd.f32 %v2665_v8, %v2386_v9 }
 0x1a8   :  { %v1064_v4 = vmax.f32 %v1059_v0, 0.0  ;;  %v2667_v5 = vpop.f32.mrf.mxu1 }
 0x1a9   :  { %v2504_v5 = vld [vmem:[%s3397_s15] ss:$0 sm:$0xff] }
 0x1aa   :  { %v2534_v6 = vpack.c.bf16 %v1064_v4, %v1064_v4 }
 0x1ac   :  { %2049 = vmatprep.mubr.bf16.mxu0 %v2534_v6 }
 0x1ad   :  { %2050 = vmatmul.mubr.bf16.vlgmr.msra.gmra.mxu0 %v2533_v7 }
 0x1ae   :  { %2714 = vmatpush3.bf16.msra.mxu0 %v2974_v29 }
 0x1af   :  { %2715 = vmatprep.subr.bf16.mxu0 %v2975_v30 }
 0x1b2   :  { %2716 = vmatpush3.bf16.msra.mxu0 %v2976_v31 }
 0x1b3   :  { %2717 = vmatprep.subr.bf16.mxu0 %v2977_v32 }
 0x1b6   :  { %2718 = vmatpush3.bf16.msra.mxu0 %v2978_v33 }
 0x1b7   :  { %2719 = vmatprep.subr.bf16.mxu0 %v2979_v34 }
 0x1ba   :  { %2720 = vmatpush3.bf16.msra.mxu0 %v2980_v35 }
 0x1bb   :  { %2721 = vmatprep.subr.bf16.mxu0 %v2981_v36 }
 0x1be   :  { %2722 = vmatpush3.bf16.msra.mxu0 %v2982_v37 }
 0x1bf   :  { %2723 = vmatprep.subr.bf16.mxu0 %v2983_v38 }
 0x1c1   :  { %v2685_v10 = vpop.f32.mrf.mxu0 }
 0x1c2   :  { %v2707_v11 = vpop.f32.mrf.mxu1  ;;  %2724 = vmatpush3.bf16.msra.mxu0 %v2984_v39 }
 0x1c3   :  { %v2686_v12 = vpop.f32.mrf.mxu0  ;;  %2725 = vmatprep.subr.bf16.mxu0 %v2985_v40 }
 0x1c4   :  { %v2708_v14 = vpop.f32.mrf.mxu1  ;;  %v2687_v16 = vadd.f32 %v2686_v12, %v2685_v10  ;;  %v2521_v10 = vld [vmem:[%s3398_s16] ss:$0 sm:$0xff] }
 0x1c5   :  { %v2709_v17 = vadd.f32 %v2708_v14, %v2707_v11  ;;  %v2688_v18 = vpop.f32.mrf.mxu0 }
 0x1c6   :  { %v2710_v19 = vpop.f32.mrf.mxu1  ;;  %v1411_v20 = vadd.f32 %v2687_v16, %v1371_v15  ;;  %2726 = vmatpush3.bf16.msra.mxu0 %v2986_v41 }
 0x1c7   :  { %v1591_v21 = vadd.f32 %v2709_v17, %v2419_v13  ;;  %v2689_v22 = vpop.f32.mrf.mxu0  ;;  %2727 = vmatprep.subr.bf16.mxu0 %v2987_v42  ;;  %v2290_v13 = vstv %s3399_s17 }
 0x1c8   :  { %v2711_v23 = vpop.f32.mrf.mxu1  ;;  %v1416_v24 = vmax.f32 %v1411_v20, 0.0 }
 0x1c9   :  { %v1596_v25 = vmax.f32 %v1591_v21, 0.0 }
 0x1ca   :  { %v2535_v26 = vpack.c.bf16 %v1416_v24, %v1416_v24  ;;  %2728 = vmatpush3.bf16.msra.mxu0 %v2988_v43 }
 0x1cb   :  { %v2536_v27 = vpack.c.bf16 %v1596_v25, %v1596_v25 }
 0x1cd   :  { %2090 = vmatprep.mubr.bf16.mxu1 %v2536_v27 }
 0x1ce   :  { %2091 = vmatmul.mubr.bf16.vlgmr.msra.gmra.mxu1 %v2535_v26 }
 0x26d   :  { %v2051_v44 = vpop.f32.mrf.mxu0 }
 0x26e   :  { %v2052_v55 = vadd.f32 %v2051_v44, %v1676_v53 }
 0x26f   :  { %v2053_v45 = vpop.f32.mrf.mxu0 }
 0x270   :  { %v2054_v57 = vadd.f32 %v2053_v45, %v1680_v54 }
 0x271   :  { %v2055_v46 = vpop.f32.mrf.mxu0 }
 0x273   :  { %v2056_v47 = vpop.f32.mrf.mxu0 }
 0x28e   :  { %v2092_v56 = vpop.f32.mrf.mxu1 }
 0x28f   :  { %v2093_v58 = vadd.f32 %v2092_v56, %v2052_v55 }
 0x290   :  { %v2094_v59 = vpop.f32.mrf.mxu1 }
 0x291   :  { %v2095_v60 = vadd.f32 %v2094_v59, %v2054_v57  ;;  %v2099_v61 = vmax.f32 %v2093_v58, 0.0 }
 0x292   :  { %v2096_v62 = vpop.f32.mrf.mxu1 }
 0x293   :  { %v2100_v63 = vmax.f32 %v2095_v60, 0.0  ;;  %v2101_v2 = vpack.c.bf16 %v2099_v61, %v2099_v61 }
 0x294   :  { %v2097_v0 = vpop.f32.mrf.mxu1 }
 0x295   :  { %v2102_v1 = vpack.c.bf16 %v2100_v63, %v2100_v63 }
 0x297   :  { %2270 = vmatprep.mubr.bf16.mxu0 %v2102_v1 }
 0x298   :  { %2271 = vmatmul.mubr.bf16.vlgmr.msra.gmra.mxu0 %v2101_v2 }
 0x358   :  { %v2729_v3 = vpop.f32.mrf.mxu0 }
 0x35a   :  { %v2730_v4 = vpop.f32.mrf.mxu0 }
 0x35b   :  { %v2731_v6 = vadd.f32 %v2730_v4, %v2729_v3 }
 0x35c   :  { %v2732_v7 = vpop.f32.mrf.mxu0 }
 0x35d   :  { %v2273_v8 = vadd.f32 %v2731_v6, %v2504_v5 }
 0x35e   :  { %v2733_v9 = vpop.f32.mrf.mxu0 }
 0x35f   :  { %v2278_v11 = vmax.f32 %v2273_v8, 0.0 }
 0x361   :  { %v2286_v12 = vmul.f32 %v2521_v10, %v2278_v11 }
 0x363   :  { %2287 = vadd.xlane.f32.xlu0 %v2286_v12 }
 0x3ec   :  { %v2288_v14 = vpop.xlane.xlu0 %2287 }
 0x3ed   :  { %v2291_v15 = vadd.f32 %v2290_v13, %v2288_v14 }
 0x3ef   :  { %2293 = vst.msk [vmem:[%s3400_s18] sm:$0xff] %vm2292_vm0, %v2291_v15 }
 0x3f0   :  { %2298 = vsyncpa [#allocation5], 1 }
 0x3f1   :  { %2299 = vsyncpa [#allocation7], 1 }
 0x3f2   :  { %2300 = vsyncpa [#allocation10], 1 }
 0x3f3   :  { %2301 = vsyncpa [#allocation13], 1 }
 0x3f4   :  { %2302 = vsyncpa [#allocation16], 1 }
 0x3f5   :  { %2303 = vsyncpa [#allocation19], 1 }

</bundles_post_ra>
